<compile_context>
chip_gen: v6e
topology: v6e:2x2x1
jax: 0.10.0
libtpu: 0.0.40
codegen_flags: <defaults>
</compile_context>

<pallas_src>
import numpy as np
import jax
import jax.numpy as jnp
from jax.experimental import pallas as pl
from jax.experimental.pallas import tpu as pltpu


# ----------------------------------------------------------------------------
# Pallas kernel: one grid step == one independent pixel tile; the full reverse
# diffusion loop (T steps) runs inside as a fori_loop with the state carried
# as C per-channel (B, HW_tile) planes (vreg-resident).
#   coef_ref  : SMEM (3*T,)  f32 -> [coeff1, coeff2, sqrt(var)] per reverse step
#   wt_ref    : SMEM (C*C,)  f32 -> transposed 1x1-conv weight, WT[co, ci] flat
#   x0_ref    : VMEM (C, B, HWt) -> initial noise x_T tile
#   add_ref   : VMEM (T, C, B, 1)-> -coeff2 * (conv bias + temb + CFG-guided label emb)
#   noise_ref : VMEM (T, C, B, HWt) -> gaussian noise per step (0 at t=0)
#   out_ref   : VMEM (C, B, HWt) -> clip(x_0, -1, 1) tile
# ----------------------------------------------------------------------------
def _sampler_kernel(coef_ref, wt_ref, x0_ref, add_ref, noise_ref, out_ref):
    C, B, HWt = x0_ref.shape
    T = noise_ref.shape[0]

    # initial per-channel planes, each (B, HWt), lane-dense
    x_init = tuple(x0_ref[c] for c in range(C))

    def step(i, xs):
        c1 = coef_ref[3 * i]
        c2 = coef_ref[3 * i + 1]
        sv = coef_ref[3 * i + 2]
        new_xs = []
        for co in range(C):                       # static unroll: VPU broadcast-FMAs
            h = wt_ref[co * C] * xs[0]            # 1x1-conv channel mix (no MXU)
            for ci in range(1, C):
                h = h + wt_ref[co * C + ci] * xs[ci]
            new_xs.append(
                c1 * xs[co] - c2 * h              # predict_xt_prev_mean_from_eps
                + add_ref[i, co]                  # folded -c2*(b + temb + CFG label emb), (B,1) lane-bcast
                + sv * noise_ref[i, co]           # + sqrt(var) * noise
            )
        return tuple(new_xs)

    xs = jax.lax.fori_loop(0, T, step, x_init, unroll=(T <= 16))

    for c in range(C):
        out_ref[c] = jnp.clip(xs[c], -1.0, 1.0).astype(out_ref.dtype)


# ----------------------------------------------------------------------------
# Diffusion schedule (matches the PyTorch __init__ buffers, computed in f64).
# ----------------------------------------------------------------------------
def make_schedule(beta_1, beta_T, T):
    betas = np.linspace(beta_1, beta_T, T, dtype=np.float64)
    alphas = 1.0 - betas
    alphas_bar = np.cumprod(alphas)
    alphas_bar_prev = np.concatenate([[1.0], alphas_bar[:-1]])
    coeff1 = np.sqrt(1.0 / alphas)
    coeff2 = coeff1 * (1.0 - alphas) / np.sqrt(1.0 - alphas_bar)
    posterior_var = betas * (1.0 - alphas_bar_prev) / (1.0 - alphas_bar)
    var = np.concatenate([posterior_var[1:2], betas[1:]])        # p_mean_variance's var table
    snr = alphas_bar / np.sqrt(1.0 - alphas_bar)
    return dict(betas=betas, alphas_bar=alphas_bar, snr=snr,
                coeff1=coeff1, coeff2=coeff2, var=var)


def _pick_tiles(HW, T, C, B, vmem_budget=24 * 1024 * 1024):
    """Lane-aligned pixel tiling: >=2 tiles when possible (one per v7x TC),
    further halved while the double-buffered noise slab overflows the budget."""
    n_tiles = 2 if HW % 256 == 0 else 1
    hw_t = HW // n_tiles

    def tile_bytes(hwt):
        # double-buffered noise tile + x_T tile + out tile + folded bias table
        return 4 * C * B * (2 * T * hwt + 4 * hwt) + 2 * 4 * T * C * B

    while tile_bytes(hw_t) > vmem_budget and hw_t % 256 == 0:
        hw_t //= 2
        n_tiles *= 2
    return n_tiles, hw_t


# ----------------------------------------------------------------------------
# Wrapper: layout, folded coefficient/bias tables, pallas_call.
# ----------------------------------------------------------------------------
def gaussian_diffusion_sample(x_T, labels, params, schedule, w, noise_seq):
    B, C, H, W = x_T.shape
    HW = H * W
    T = int(schedule["coeff1"].shape[0])

    # channel-major, lane-dense layout: (C, B, HW); HW is a multiple of 128
    x0 = jnp.transpose(x_T, (1, 0, 2, 3)).reshape(C, B, HW).astype(jnp.float32)
    noise = jnp.transpose(noise_seq.reshape(T, B, C, HW), (0, 2, 1, 3)).astype(jnp.float32)

    # per-(reverse)-step scalars, flattened 1-D for SMEM: [c1, c2, sqrt(var)] * T
    ts = np.arange(T - 1, -1, -1)
    c1 = schedule["coeff1"][ts]
    c2 = schedule["coeff2"][ts]
    sv = np.sqrt(schedule["var"][ts])
    coef = jnp.asarray(np.stack([c1, c2, sv], axis=1).reshape(-1).astype(np.float32))   # (3T,)

    # transposed conv weight as flat SMEM scalars: WT[co, ci] = W[ci, co]
    wt = jnp.asarray(params["W"]).T.reshape(-1).astype(jnp.float32)                     # (C*C,)

    # folded additive term per (step, channel, batch):
    #   add[i, c, b] = -coeff2[t_i] * (b[c] + temb[t_i, c] + (1+w)*yemb[label_b, c] - w*yemb[0, c])
    y_g = (1.0 + w) * params["yemb"][labels] - w * params["yemb"][jnp.zeros_like(labels)]   # (B, C)
    te = params["temb"][jnp.asarray(ts)]                                                    # (T, C)
    bias = params["b"][None, None, :] + te[:, None, :] + y_g[None, :, :]                    # (T, B, C)
    add = (-jnp.asarray(c2.astype(np.float32))[:, None, None]) * bias                       # (T, B, C)
    add = jnp.transpose(add, (0, 2, 1))[..., None].astype(jnp.float32)                      # (T, C, B, 1)

    n_tiles, hw_t = _pick_tiles(HW, T, C, B)

    smem = pltpu.MemorySpace.SMEM
    out_flat = pl.pallas_call(
        _sampler_kernel,
        out_shape=jax.ShapeDtypeStruct((C, B, HW), jnp.float32),
        grid=(n_tiles,),
        in_specs=[
            pl.BlockSpec(memory_space=smem),                          # coef  (3T,)
            pl.BlockSpec(memory_space=smem),                          # WT    (C*C,)
            pl.BlockSpec((C, B, hw_t), lambda j: (0, 0, j)),          # x_T tile
            pl.BlockSpec((T, C, B, 1), lambda j: (0, 0, 0, 0)),       # folded bias table
            pl.BlockSpec((T, C, B, hw_t), lambda j: (0, 0, 0, j)),    # noise tile
        ],
        out_specs=pl.BlockSpec((C, B, hw_t), lambda j: (0, 0, j)),
        compiler_params=pltpu.CompilerParams(
            dimension_semantics=("parallel",),
            vmem_limit_bytes=32 * 1024 * 1024,
        ),
    )(coef, wt, x0, add, noise)

    return out_flat.reshape(C, B, H, W).transpose(1, 0, 2, 3)         # back to NCHW


# ----------------------------------------------------------------------------
# Pure-JAX reference (same synthetic model, NCHW) for a correctness check.
# ----------------------------------------------------------------------------
def reference_sample(x_T, labels, params, schedule, w, noise_seq):
    B, C, H, W = x_T.shape
    T = schedule["coeff1"].shape[0]
    x = x_T.astype(jnp.float32)
    Wc = params["W"]
    b = params["b"].reshape(1, C, 1, 1)
    ylab = params["yemb"][labels].reshape(B, C, 1, 1)
    ynull = params["yemb"][jnp.zeros_like(labels)].reshape(B, C, 1, 1)
    for i, time_step in enumerate(range(T - 1, -1, -1)):
        h = jnp.einsum("bchw,cd->bdhw", x, Wc) + b
        te = params["temb"][time_step].reshape(1, C, 1, 1)
        eps = h + te + ylab
        non_eps = h + te + ynull
        eps_g = (1.0 + np.float32(w)) * eps - np.float32(w) * non_eps
        c1 = np.float32(schedule["coeff1"][time_step])
        c2 = np.float32(schedule["coeff2"][time_step])
        sv = np.float32(np.sqrt(schedule["var"][time_step]))
        x = c1 * x - c2 * eps_g + sv * noise_seq[i]
    return jnp.clip(x, -1.0, 1.0)


if __name__ == "__main__":
    # small shapes
    B, C, H, W = 2, 4, 16, 16
    T = 8
    num_classes = 10
    beta_1, beta_T = 1e-4, 0.02
    cfg_w = 1.8

    key = jax.random.PRNGKey(0)
    k_x, k_lab, k_W, k_te, k_ye, k_noise = jax.random.split(key, 6)

    x_T = jax.random.normal(k_x, (B, C, H, W), dtype=jnp.float32)
    labels = jax.random.randint(k_lab, (B,), 0, num_classes)

    # deterministic synthetic eps-model parameters
    params = dict(
        W=0.05 * jax.random.normal(k_W, (C, C), dtype=jnp.float32),
        b=jnp.zeros((C,), dtype=jnp.float32),
        temb=0.05 * jax.random.normal(k_te, (T, C), dtype=jnp.float32),
        yemb=0.05 * jax.random.normal(k_ye, (num_classes, C), dtype=jnp.float32),
    )

    schedule = make_schedule(beta_1, beta_T, T)

    # noise for each reverse step, ordered i -> time_step = T-1-i; zero at t=0
    noise_seq = jax.random.normal(k_noise, (T, B, C, H, W), dtype=jnp.float32)
    noise_seq = noise_seq.at[T - 1].set(0.0)

    out = gaussian_diffusion_sample(x_T, labels, params, schedule, cfg_w, noise_seq)
    out = jax.block_until_ready(out)

    assert out.shape == (B, C, H, W)
    assert not bool(jnp.any(jnp.isnan(out))), "nan in tensor."

    ref = jax.block_until_ready(
        reference_sample(x_T, labels, params, schedule, cfg_w, noise_seq))
    np.testing.assert_allclose(np.asarray(out), np.asarray(ref),
                               rtol=1e-2, atol=1e-2)

    print("KERNEL_OK")
</pallas_src>

<mosaic_0001>
module attributes {stable_mosaic.version = 11 : i64} {
  func.func @_sampler_kernel(%arg0: i32, %arg1: memref<24xf32, #tpu.memory_space<smem>>, %arg2: memref<16xf32, #tpu.memory_space<smem>>, %arg3: memref<4x2x128xf32, #tpu.memory_space<vmem>>, %arg4: memref<8x4x2x1xf32, #tpu.memory_space<vmem>>, %arg5: memref<8x4x2x128xf32, #tpu.memory_space<vmem>>, %arg6: memref<4x2x128xf32, #tpu.memory_space<vmem>>) attributes {dimension_semantics = [#tpu.dimension_semantics<parallel>], iteration_bounds = array<i64: 2>, scalar_prefetch = 0 : i64, scratch_operands = 0 : i64, tpu.core_type = #tpu.core_type<tc>, window_params = [{transform_indices = @transform_0, window_bounds = array<i64: 24>}, {transform_indices = @transform_1, window_bounds = array<i64: 16>}, {transform_indices = @transform_2, window_bounds = array<i64: 4, 2, 128>}, {pipeline_mode = #tpu.pipeline_mode<synchronous>, transform_indices = @transform_3, window_bounds = array<i64: 8, 4, 2, 1>}, {transform_indices = @transform_4, window_bounds = array<i64: 8, 4, 2, 128>}, {transform_indices = @transform_5, window_bounds = array<i64: 4, 2, 128>}]} {
    %c0 = arith.constant 0 : index
    %c0_0 = arith.constant 0 : index
    %c0_1 = arith.constant 0 : index
    %0 = vector.load %arg3[%c0, %c0_0, %c0_1] : memref<4x2x128xf32, #tpu.memory_space<vmem>>, vector<1x2x128xf32>
    %1 = vector.shape_cast %0 : vector<1x2x128xf32> to vector<2x128xf32>
    %c1 = arith.constant 1 : index
    %c0_2 = arith.constant 0 : index
    %c0_3 = arith.constant 0 : index
    %2 = vector.load %arg3[%c1, %c0_2, %c0_3] : memref<4x2x128xf32, #tpu.memory_space<vmem>>, vector<1x2x128xf32>
    %3 = vector.shape_cast %2 : vector<1x2x128xf32> to vector<2x128xf32>
    %c2 = arith.constant 2 : index
    %c0_4 = arith.constant 0 : index
    %c0_5 = arith.constant 0 : index
    %4 = vector.load %arg3[%c2, %c0_4, %c0_5] : memref<4x2x128xf32, #tpu.memory_space<vmem>>, vector<1x2x128xf32>
    %5 = vector.shape_cast %4 : vector<1x2x128xf32> to vector<2x128xf32>
    %c3 = arith.constant 3 : index
    %c0_6 = arith.constant 0 : index
    %c0_7 = arith.constant 0 : index
    %6 = vector.load %arg3[%c3, %c0_6, %c0_7] : memref<4x2x128xf32, #tpu.memory_space<vmem>>, vector<1x2x128xf32>
    %7 = vector.shape_cast %6 : vector<1x2x128xf32> to vector<2x128xf32>
    %c0_i32 = arith.constant 0 : i32
    %c3_i32 = arith.constant 3 : i32
    %8 = arith.muli %c3_i32, %c0_i32 : i32
    %9 = arith.index_cast %8 : i32 to index
    %10 = memref.load %arg1[%9] : memref<24xf32, #tpu.memory_space<smem>>
    %c3_i32_8 = arith.constant 3 : i32
    %11 = arith.muli %c3_i32_8, %c0_i32 : i32
    %c1_i32 = arith.constant 1 : i32
    %12 = arith.addi %11, %c1_i32 : i32
    %13 = arith.index_cast %12 : i32 to index
    %14 = memref.load %arg1[%13] : memref<24xf32, #tpu.memory_space<smem>>
    %c3_i32_9 = arith.constant 3 : i32
    %15 = arith.muli %c3_i32_9, %c0_i32 : i32
    %c2_i32 = arith.constant 2 : i32
    %16 = arith.addi %15, %c2_i32 : i32
    %17 = arith.index_cast %16 : i32 to index
    %18 = memref.load %arg1[%17] : memref<24xf32, #tpu.memory_space<smem>>
    %c0_10 = arith.constant 0 : index
    %19 = memref.load %arg2[%c0_10] : memref<16xf32, #tpu.memory_space<smem>>
    %20 = vector.broadcast %19 : f32 to vector<2x128xf32>
    %21 = arith.mulf %20, %1 : vector<2x128xf32>
    %c1_11 = arith.constant 1 : index
    %22 = memref.load %arg2[%c1_11] : memref<16xf32, #tpu.memory_space<smem>>
    %23 = vector.broadcast %22 : f32 to vector<2x128xf32>
    %24 = arith.mulf %23, %3 : vector<2x128xf32>
    %25 = arith.addf %21, %24 : vector<2x128xf32>
    %c2_12 = arith.constant 2 : index
    %26 = memref.load %arg2[%c2_12] : memref<16xf32, #tpu.memory_space<smem>>
    %27 = vector.broadcast %26 : f32 to vector<2x128xf32>
    %28 = arith.mulf %27, %5 : vector<2x128xf32>
    %29 = arith.addf %25, %28 : vector<2x128xf32>
    %c3_13 = arith.constant 3 : index
    %30 = memref.load %arg2[%c3_13] : memref<16xf32, #tpu.memory_space<smem>>
    %31 = vector.broadcast %30 : f32 to vector<2x128xf32>
    %32 = arith.mulf %31, %7 : vector<2x128xf32>
    %33 = arith.addf %29, %32 : vector<2x128xf32>
    %34 = vector.broadcast %10 : f32 to vector<2x128xf32>
    %35 = arith.mulf %34, %1 : vector<2x128xf32>
    %36 = vector.broadcast %14 : f32 to vector<2x128xf32>
    %37 = arith.mulf %36, %33 : vector<2x128xf32>
    %38 = arith.subf %35, %37 : vector<2x128xf32>
    %39 = arith.index_cast %c0_i32 : i32 to index
    %c0_14 = arith.constant 0 : index
    %c0_15 = arith.constant 0 : index
    %c0_16 = arith.constant 0 : index
    %40 = vector.load %arg4[%39, %c0_14, %c0_15, %c0_16] : memref<8x4x2x1xf32, #tpu.memory_space<vmem>>, vector<1x1x2x1xf32>
    %41 = vector.shape_cast %40 : vector<1x1x2x1xf32> to vector<2x1xf32>
    %42 = vector.broadcast %41 : vector<2x1xf32> to vector<2x128xf32>
    %43 = arith.addf %38, %42 : vector<2x128xf32>
    %44 = arith.index_cast %c0_i32 : i32 to index
    %c0_17 = arith.constant 0 : index
    %c0_18 = arith.constant 0 : index
    %c0_19 = arith.constant 0 : index
    %45 = vector.load %arg5[%44, %c0_17, %c0_18, %c0_19] : memref<8x4x2x128xf32, #tpu.memory_space<vmem>>, vector<1x1x2x128xf32>
    %46 = vector.shape_cast %45 : vector<1x1x2x128xf32> to vector<2x128xf32>
    %47 = vector.broadcast %18 : f32 to vector<2x128xf32>
    %48 = arith.mulf %47, %46 : vector<2x128xf32>
    %49 = arith.addf %43, %48 : vector<2x128xf32>
    %c4 = arith.constant 4 : index
    %50 = memref.load %arg2[%c4] : memref<16xf32, #tpu.memory_space<smem>>
    %51 = vector.broadcast %50 : f32 to vector<2x128xf32>
    %52 = arith.mulf %51, %1 : vector<2x128xf32>
    %c5 = arith.constant 5 : index
    %53 = memref.load %arg2[%c5] : memref<16xf32, #tpu.memory_space<smem>>
    %54 = vector.broadcast %53 : f32 to vector<2x128xf32>
    %55 = arith.mulf %54, %3 : vector<2x128xf32>
    %56 = arith.addf %52, %55 : vector<2x128xf32>
    %c6 = arith.constant 6 : index
    %57 = memref.load %arg2[%c6] : memref<16xf32, #tpu.memory_space<smem>>
    %58 = vector.broadcast %57 : f32 to vector<2x128xf32>
    %59 = arith.mulf %58, %5 : vector<2x128xf32>
    %60 = arith.addf %56, %59 : vector<2x128xf32>
    %c7 = arith.constant 7 : index
    %61 = memref.load %arg2[%c7] : memref<16xf32, #tpu.memory_space<smem>>
    %62 = vector.broadcast %61 : f32 to vector<2x128xf32>
    %63 = arith.mulf %62, %7 : vector<2x128xf32>
    %64 = arith.addf %60, %63 : vector<2x128xf32>
    %65 = vector.broadcast %10 : f32 to vector<2x128xf32>
    %66 = arith.mulf %65, %3 : vector<2x128xf32>
    %67 = vector.broadcast %14 : f32 to vector<2x128xf32>
    %68 = arith.mulf %67, %64 : vector<2x128xf32>
    %69 = arith.subf %66, %68 : vector<2x128xf32>
    %70 = arith.index_cast %c0_i32 : i32 to index
    %c1_20 = arith.constant 1 : index
    %c0_21 = arith.constant 0 : index
    %c0_22 = arith.constant 0 : index
    %71 = vector.load %arg4[%70, %c1_20, %c0_21, %c0_22] : memref<8x4x2x1xf32, #tpu.memory_space<vmem>>, vector<1x1x2x1xf32>
    %72 = vector.shape_cast %71 : vector<1x1x2x1xf32> to vector<2x1xf32>
    %73 = vector.broadcast %72 : vector<2x1xf32> to vector<2x128xf32>
    %74 = arith.addf %69, %73 : vector<2x128xf32>
    %75 = arith.index_cast %c0_i32 : i32 to index
    %c1_23 = arith.constant 1 : index
    %c0_24 = arith.constant 0 : index
    %c0_25 = arith.constant 0 : index
    %76 = vector.load %arg5[%75, %c1_23, %c0_24, %c0_25] : memref<8x4x2x128xf32, #tpu.memory_space<vmem>>, vector<1x1x2x128xf32>
    %77 = vector.shape_cast %76 : vector<1x1x2x128xf32> to vector<2x128xf32>
    %78 = vector.broadcast %18 : f32 to vector<2x128xf32>
    %79 = arith.mulf %78, %77 : vector<2x128xf32>
    %80 = arith.addf %74, %79 : vector<2x128xf32>
    %c8 = arith.constant 8 : index
    %81 = memref.load %arg2[%c8] : memref<16xf32, #tpu.memory_space<smem>>
    %82 = vector.broadcast %81 : f32 to vector<2x128xf32>
    %83 = arith.mulf %82, %1 : vector<2x128xf32>
    %c9 = arith.constant 9 : index
    %84 = memref.load %arg2[%c9] : memref<16xf32, #tpu.memory_space<smem>>
    %85 = vector.broadcast %84 : f32 to vector<2x128xf32>
    %86 = arith.mulf %85, %3 : vector<2x128xf32>
    %87 = arith.addf %83, %86 : vector<2x128xf32>
    %c10 = arith.constant 10 : index
    %88 = memref.load %arg2[%c10] : memref<16xf32, #tpu.memory_space<smem>>
    %89 = vector.broadcast %88 : f32 to vector<2x128xf32>
    %90 = arith.mulf %89, %5 : vector<2x128xf32>
    %91 = arith.addf %87, %90 : vector<2x128xf32>
    %c11 = arith.constant 11 : index
    %92 = memref.load %arg2[%c11] : memref<16xf32, #tpu.memory_space<smem>>
    %93 = vector.broadcast %92 : f32 to vector<2x128xf32>
    %94 = arith.mulf %93, %7 : vector<2x128xf32>
    %95 = arith.addf %91, %94 : vector<2x128xf32>
    %96 = vector.broadcast %10 : f32 to vector<2x128xf32>
    %97 = arith.mulf %96, %5 : vector<2x128xf32>
    %98 = vector.broadcast %14 : f32 to vector<2x128xf32>
    %99 = arith.mulf %98, %95 : vector<2x128xf32>
    %100 = arith.subf %97, %99 : vector<2x128xf32>
    %101 = arith.index_cast %c0_i32 : i32 to index
    %c2_26 = arith.constant 2 : index
    %c0_27 = arith.constant 0 : index
    %c0_28 = arith.constant 0 : index
    %102 = vector.load %arg4[%101, %c2_26, %c0_27, %c0_28] : memref<8x4x2x1xf32, #tpu.memory_space<vmem>>, vector<1x1x2x1xf32>
    %103 = vector.shape_cast %102 : vector<1x1x2x1xf32> to vector<2x1xf32>
    %104 = vector.broadcast %103 : vector<2x1xf32> to vector<2x128xf32>
    %105 = arith.addf %100, %104 : vector<2x128xf32>
    %106 = arith.index_cast %c0_i32 : i32 to index
    %c2_29 = arith.constant 2 : index
    %c0_30 = arith.constant 0 : index
    %c0_31 = arith.constant 0 : index
    %107 = vector.load %arg5[%106, %c2_29, %c0_30, %c0_31] : memref<8x4x2x128xf32, #tpu.memory_space<vmem>>, vector<1x1x2x128xf32>
    %108 = vector.shape_cast %107 : vector<1x1x2x128xf32> to vector<2x128xf32>
    %109 = vector.broadcast %18 : f32 to vector<2x128xf32>
    %110 = arith.mulf %109, %108 : vector<2x128xf32>
    %111 = arith.addf %105, %110 : vector<2x128xf32>
    %c12 = arith.constant 12 : index
    %112 = memref.load %arg2[%c12] : memref<16xf32, #tpu.memory_space<smem>>
    %113 = vector.broadcast %112 : f32 to vector<2x128xf32>
    %114 = arith.mulf %113, %1 : vector<2x128xf32>
    %c13 = arith.constant 13 : index
    %115 = memref.load %arg2[%c13] : memref<16xf32, #tpu.memory_space<smem>>
    %116 = vector.broadcast %115 : f32 to vector<2x128xf32>
    %117 = arith.mulf %116, %3 : vector<2x128xf32>
    %118 = arith.addf %114, %117 : vector<2x128xf32>
    %c14 = arith.constant 14 : index
    %119 = memref.load %arg2[%c14] : memref<16xf32, #tpu.memory_space<smem>>
    %120 = vector.broadcast %119 : f32 to vector<2x128xf32>
    %121 = arith.mulf %120, %5 : vector<2x128xf32>
    %122 = arith.addf %118, %121 : vector<2x128xf32>
    %c15 = arith.constant 15 : index
    %123 = memref.load %arg2[%c15] : memref<16xf32, #tpu.memory_space<smem>>
    %124 = vector.broadcast %123 : f32 to vector<2x128xf32>
    %125 = arith.mulf %124, %7 : vector<2x128xf32>
    %126 = arith.addf %122, %125 : vector<2x128xf32>
    %127 = vector.broadcast %10 : f32 to vector<2x128xf32>
    %128 = arith.mulf %127, %7 : vector<2x128xf32>
    %129 = vector.broadcast %14 : f32 to vector<2x128xf32>
    %130 = arith.mulf %129, %126 : vector<2x128xf32>
    %131 = arith.subf %128, %130 : vector<2x128xf32>
    %132 = arith.index_cast %c0_i32 : i32 to index
    %c3_32 = arith.constant 3 : index
    %c0_33 = arith.constant 0 : index
    %c0_34 = arith.constant 0 : index
    %133 = vector.load %arg4[%132, %c3_32, %c0_33, %c0_34] : memref<8x4x2x1xf32, #tpu.memory_space<vmem>>, vector<1x1x2x1xf32>
    %134 = vector.shape_cast %133 : vector<1x1x2x1xf32> to vector<2x1xf32>
    %135 = vector.broadcast %134 : vector<2x1xf32> to vector<2x128xf32>
    %136 = arith.addf %131, %135 : vector<2x128xf32>
    %137 = arith.index_cast %c0_i32 : i32 to index
    %c3_35 = arith.constant 3 : index
    %c0_36 = arith.constant 0 : index
    %c0_37 = arith.constant 0 : index
    %138 = vector.load %arg5[%137, %c3_35, %c0_36, %c0_37] : memref<8x4x2x128xf32, #tpu.memory_space<vmem>>, vector<1x1x2x128xf32>
    %139 = vector.shape_cast %138 : vector<1x1x2x128xf32> to vector<2x128xf32>
    %140 = vector.broadcast %18 : f32 to vector<2x128xf32>
    %141 = arith.mulf %140, %139 : vector<2x128xf32>
    %142 = arith.addf %136, %141 : vector<2x128xf32>
    %c1_i32_38 = arith.constant 1 : i32
    %c3_i32_39 = arith.constant 3 : i32
    %143 = arith.muli %c3_i32_39, %c1_i32_38 : i32
    %144 = arith.index_cast %143 : i32 to index
    %145 = memref.load %arg1[%144] : memref<24xf32, #tpu.memory_space<smem>>
    %c3_i32_40 = arith.constant 3 : i32
    %146 = arith.muli %c3_i32_40, %c1_i32_38 : i32
    %c1_i32_41 = arith.constant 1 : i32
    %147 = arith.addi %146, %c1_i32_41 : i32
    %148 = arith.index_cast %147 : i32 to index
    %149 = memref.load %arg1[%148] : memref<24xf32, #tpu.memory_space<smem>>
    %c3_i32_42 = arith.constant 3 : i32
    %150 = arith.muli %c3_i32_42, %c1_i32_38 : i32
    %c2_i32_43 = arith.constant 2 : i32
    %151 = arith.addi %150, %c2_i32_43 : i32
    %152 = arith.index_cast %151 : i32 to index
    %153 = memref.load %arg1[%152] : memref<24xf32, #tpu.memory_space<smem>>
    %c0_44 = arith.constant 0 : index
    %154 = memref.load %arg2[%c0_44] : memref<16xf32, #tpu.memory_space<smem>>
    %155 = vector.broadcast %154 : f32 to vector<2x128xf32>
    %156 = arith.mulf %155, %49 : vector<2x128xf32>
    %c1_45 = arith.constant 1 : index
    %157 = memref.load %arg2[%c1_45] : memref<16xf32, #tpu.memory_space<smem>>
    %158 = vector.broadcast %157 : f32 to vector<2x128xf32>
    %159 = arith.mulf %158, %80 : vector<2x128xf32>
    %160 = arith.addf %156, %159 : vector<2x128xf32>
    %c2_46 = arith.constant 2 : index
    %161 = memref.load %arg2[%c2_46] : memref<16xf32, #tpu.memory_space<smem>>
    %162 = vector.broadcast %161 : f32 to vector<2x128xf32>
    %163 = arith.mulf %162, %111 : vector<2x128xf32>
    %164 = arith.addf %160, %163 : vector<2x128xf32>
    %c3_47 = arith.constant 3 : index
    %165 = memref.load %arg2[%c3_47] : memref<16xf32, #tpu.memory_space<smem>>
    %166 = vector.broadcast %165 : f32 to vector<2x128xf32>
    %167 = arith.mulf %166, %142 : vector<2x128xf32>
    %168 = arith.addf %164, %167 : vector<2x128xf32>
    %169 = vector.broadcast %145 : f32 to vector<2x128xf32>
    %170 = arith.mulf %169, %49 : vector<2x128xf32>
    %171 = vector.broadcast %149 : f32 to vector<2x128xf32>
    %172 = arith.mulf %171, %168 : vector<2x128xf32>
    %173 = arith.subf %170, %172 : vector<2x128xf32>
    %174 = arith.index_cast %c1_i32_38 : i32 to index
    %c0_48 = arith.constant 0 : index
    %c0_49 = arith.constant 0 : index
    %c0_50 = arith.constant 0 : index
    %175 = vector.load %arg4[%174, %c0_48, %c0_49, %c0_50] : memref<8x4x2x1xf32, #tpu.memory_space<vmem>>, vector<1x1x2x1xf32>
    %176 = vector.shape_cast %175 : vector<1x1x2x1xf32> to vector<2x1xf32>
    %177 = vector.broadcast %176 : vector<2x1xf32> to vector<2x128xf32>
    %178 = arith.addf %173, %177 : vector<2x128xf32>
    %179 = arith.index_cast %c1_i32_38 : i32 to index
    %c0_51 = arith.constant 0 : index
    %c0_52 = arith.constant 0 : index
    %c0_53 = arith.constant 0 : index
    %180 = vector.load %arg5[%179, %c0_51, %c0_52, %c0_53] : memref<8x4x2x128xf32, #tpu.memory_space<vmem>>, vector<1x1x2x128xf32>
    %181 = vector.shape_cast %180 : vector<1x1x2x128xf32> to vector<2x128xf32>
    %182 = vector.broadcast %153 : f32 to vector<2x128xf32>
    %183 = arith.mulf %182, %181 : vector<2x128xf32>
    %184 = arith.addf %178, %183 : vector<2x128xf32>
    %c4_54 = arith.constant 4 : index
    %185 = memref.load %arg2[%c4_54] : memref<16xf32, #tpu.memory_space<smem>>
    %186 = vector.broadcast %185 : f32 to vector<2x128xf32>
    %187 = arith.mulf %186, %49 : vector<2x128xf32>
    %c5_55 = arith.constant 5 : index
    %188 = memref.load %arg2[%c5_55] : memref<16xf32, #tpu.memory_space<smem>>
    %189 = vector.broadcast %188 : f32 to vector<2x128xf32>
    %190 = arith.mulf %189, %80 : vector<2x128xf32>
    %191 = arith.addf %187, %190 : vector<2x128xf32>
    %c6_56 = arith.constant 6 : index
    %192 = memref.load %arg2[%c6_56] : memref<16xf32, #tpu.memory_space<smem>>
    %193 = vector.broadcast %192 : f32 to vector<2x128xf32>
    %194 = arith.mulf %193, %111 : vector<2x128xf32>
    %195 = arith.addf %191, %194 : vector<2x128xf32>
    %c7_57 = arith.constant 7 : index
    %196 = memref.load %arg2[%c7_57] : memref<16xf32, #tpu.memory_space<smem>>
    %197 = vector.broadcast %196 : f32 to vector<2x128xf32>
    %198 = arith.mulf %197, %142 : vector<2x128xf32>
    %199 = arith.addf %195, %198 : vector<2x128xf32>
    %200 = vector.broadcast %145 : f32 to vector<2x128xf32>
    %201 = arith.mulf %200, %80 : vector<2x128xf32>
    %202 = vector.broadcast %149 : f32 to vector<2x128xf32>
    %203 = arith.mulf %202, %199 : vector<2x128xf32>
    %204 = arith.subf %201, %203 : vector<2x128xf32>
    %205 = arith.index_cast %c1_i32_38 : i32 to index
    %c1_58 = arith.constant 1 : index
    %c0_59 = arith.constant 0 : index
    %c0_60 = arith.constant 0 : index
    %206 = vector.load %arg4[%205, %c1_58, %c0_59, %c0_60] : memref<8x4x2x1xf32, #tpu.memory_space<vmem>>, vector<1x1x2x1xf32>
    %207 = vector.shape_cast %206 : vector<1x1x2x1xf32> to vector<2x1xf32>
    %208 = vector.broadcast %207 : vector<2x1xf32> to vector<2x128xf32>
    %209 = arith.addf %204, %208 : vector<2x128xf32>
    %210 = arith.index_cast %c1_i32_38 : i32 to index
    %c1_61 = arith.constant 1 : index
    %c0_62 = arith.constant 0 : index
    %c0_63 = arith.constant 0 : index
    %211 = vector.load %arg5[%210, %c1_61, %c0_62, %c0_63] : memref<8x4x2x128xf32, #tpu.memory_space<vmem>>, vector<1x1x2x128xf32>
    %212 = vector.shape_cast %211 : vector<1x1x2x128xf32> to vector<2x128xf32>
    %213 = vector.broadcast %153 : f32 to vector<2x128xf32>
    %214 = arith.mulf %213, %212 : vector<2x128xf32>
    %215 = arith.addf %209, %214 : vector<2x128xf32>
    %c8_64 = arith.constant 8 : index
    %216 = memref.load %arg2[%c8_64] : memref<16xf32, #tpu.memory_space<smem>>
    %217 = vector.broadcast %216 : f32 to vector<2x128xf32>
    %218 = arith.mulf %217, %49 : vector<2x128xf32>
    %c9_65 = arith.constant 9 : index
    %219 = memref.load %arg2[%c9_65] : memref<16xf32, #tpu.memory_space<smem>>
    %220 = vector.broadcast %219 : f32 to vector<2x128xf32>
    %221 = arith.mulf %220, %80 : vector<2x128xf32>
    %222 = arith.addf %218, %221 : vector<2x128xf32>
    %c10_66 = arith.constant 10 : index
    %223 = memref.load %arg2[%c10_66] : memref<16xf32, #tpu.memory_space<smem>>
    %224 = vector.broadcast %223 : f32 to vector<2x128xf32>
    %225 = arith.mulf %224, %111 : vector<2x128xf32>
    %226 = arith.addf %222, %225 : vector<2x128xf32>
    %c11_67 = arith.constant 11 : index
    %227 = memref.load %arg2[%c11_67] : memref<16xf32, #tpu.memory_space<smem>>
    %228 = vector.broadcast %227 : f32 to vector<2x128xf32>
    %229 = arith.mulf %228, %142 : vector<2x128xf32>
    %230 = arith.addf %226, %229 : vector<2x128xf32>
    %231 = vector.broadcast %145 : f32 to vector<2x128xf32>
    %232 = arith.mulf %231, %111 : vector<2x128xf32>
    %233 = vector.broadcast %149 : f32 to vector<2x128xf32>
    %234 = arith.mulf %233, %230 : vector<2x128xf32>
    %235 = arith.subf %232, %234 : vector<2x128xf32>
    %236 = arith.index_cast %c1_i32_38 : i32 to index
    %c2_68 = arith.constant 2 : index
    %c0_69 = arith.constant 0 : index
    %c0_70 = arith.constant 0 : index
    %237 = vector.load %arg4[%236, %c2_68, %c0_69, %c0_70] : memref<8x4x2x1xf32, #tpu.memory_space<vmem>>, vector<1x1x2x1xf32>
    %238 = vector.shape_cast %237 : vector<1x1x2x1xf32> to vector<2x1xf32>
    %239 = vector.broadcast %238 : vector<2x1xf32> to vector<2x128xf32>
    %240 = arith.addf %235, %239 : vector<2x128xf32>
    %241 = arith.index_cast %c1_i32_38 : i32 to index
    %c2_71 = arith.constant 2 : index
    %c0_72 = arith.constant 0 : index
    %c0_73 = arith.constant 0 : index
    %242 = vector.load %arg5[%241, %c2_71, %c0_72, %c0_73] : memref<8x4x2x128xf32, #tpu.memory_space<vmem>>, vector<1x1x2x128xf32>
    %243 = vector.shape_cast %242 : vector<1x1x2x128xf32> to vector<2x128xf32>
    %244 = vector.broadcast %153 : f32 to vector<2x128xf32>
    %245 = arith.mulf %244, %243 : vector<2x128xf32>
    %246 = arith.addf %240, %245 : vector<2x128xf32>
    %c12_74 = arith.constant 12 : index
    %247 = memref.load %arg2[%c12_74] : memref<16xf32, #tpu.memory_space<smem>>
    %248 = vector.broadcast %247 : f32 to vector<2x128xf32>
    %249 = arith.mulf %248, %49 : vector<2x128xf32>
    %c13_75 = arith.constant 13 : index
    %250 = memref.load %arg2[%c13_75] : memref<16xf32, #tpu.memory_space<smem>>
    %251 = vector.broadcast %250 : f32 to vector<2x128xf32>
    %252 = arith.mulf %251, %80 : vector<2x128xf32>
    %253 = arith.addf %249, %252 : vector<2x128xf32>
    %c14_76 = arith.constant 14 : index
    %254 = memref.load %arg2[%c14_76] : memref<16xf32, #tpu.memory_space<smem>>
    %255 = vector.broadcast %254 : f32 to vector<2x128xf32>
    %256 = arith.mulf %255, %111 : vector<2x128xf32>
    %257 = arith.addf %253, %256 : vector<2x128xf32>
    %c15_77 = arith.constant 15 : index
    %258 = memref.load %arg2[%c15_77] : memref<16xf32, #tpu.memory_space<smem>>
    %259 = vector.broadcast %258 : f32 to vector<2x128xf32>
    %260 = arith.mulf %259, %142 : vector<2x128xf32>
    %261 = arith.addf %257, %260 : vector<2x128xf32>
    %262 = vector.broadcast %145 : f32 to vector<2x128xf32>
    %263 = arith.mulf %262, %142 : vector<2x128xf32>
    %264 = vector.broadcast %149 : f32 to vector<2x128xf32>
    %265 = arith.mulf %264, %261 : vector<2x128xf32>
    %266 = arith.subf %263, %265 : vector<2x128xf32>
    %267 = arith.index_cast %c1_i32_38 : i32 to index
    %c3_78 = arith.constant 3 : index
    %c0_79 = arith.constant 0 : index
    %c0_80 = arith.constant 0 : index
    %268 = vector.load %arg4[%267, %c3_78, %c0_79, %c0_80] : memref<8x4x2x1xf32, #tpu.memory_space<vmem>>, vector<1x1x2x1xf32>
    %269 = vector.shape_cast %268 : vector<1x1x2x1xf32> to vector<2x1xf32>
    %270 = vector.broadcast %269 : vector<2x1xf32> to vector<2x128xf32>
    %271 = arith.addf %266, %270 : vector<2x128xf32>
    %272 = arith.index_cast %c1_i32_38 : i32 to index
    %c3_81 = arith.constant 3 : index
    %c0_82 = arith.constant 0 : index
    %c0_83 = arith.constant 0 : index
    %273 = vector.load %arg5[%272, %c3_81, %c0_82, %c0_83] : memref<8x4x2x128xf32, #tpu.memory_space<vmem>>, vector<1x1x2x128xf32>
    %274 = vector.shape_cast %273 : vector<1x1x2x128xf32> to vector<2x128xf32>
    %275 = vector.broadcast %153 : f32 to vector<2x128xf32>
    %276 = arith.mulf %275, %274 : vector<2x128xf32>
    %277 = arith.addf %271, %276 : vector<2x128xf32>
    %c2_i32_84 = arith.constant 2 : i32
    %c3_i32_85 = arith.constant 3 : i32
    %278 = arith.muli %c3_i32_85, %c2_i32_84 : i32
    %279 = arith.index_cast %278 : i32 to index
    %280 = memref.load %arg1[%279] : memref<24xf32, #tpu.memory_space<smem>>
    %c3_i32_86 = arith.constant 3 : i32
    %281 = arith.muli %c3_i32_86, %c2_i32_84 : i32
    %c1_i32_87 = arith.constant 1 : i32
    %282 = arith.addi %281, %c1_i32_87 : i32
    %283 = arith.index_cast %282 : i32 to index
    %284 = memref.load %arg1[%283] : memref<24xf32, #tpu.memory_space<smem>>
    %c3_i32_88 = arith.constant 3 : i32
    %285 = arith.muli %c3_i32_88, %c2_i32_84 : i32
    %c2_i32_89 = arith.constant 2 : i32
    %286 = arith.addi %285, %c2_i32_89 : i32
    %287 = arith.index_cast %286 : i32 to index
    %288 = memref.load %arg1[%287] : memref<24xf32, #tpu.memory_space<smem>>
    %c0_90 = arith.constant 0 : index
    %289 = memref.load %arg2[%c0_90] : memref<16xf32, #tpu.memory_space<smem>>
    %290 = vector.broadcast %289 : f32 to vector<2x128xf32>
    %291 = arith.mulf %290, %184 : vector<2x128xf32>
    %c1_91 = arith.constant 1 : index
    %292 = memref.load %arg2[%c1_91] : memref<16xf32, #tpu.memory_space<smem>>
    %293 = vector.broadcast %292 : f32 to vector<2x128xf32>
    %294 = arith.mulf %293, %215 : vector<2x128xf32>
    %295 = arith.addf %291, %294 : vector<2x128xf32>
    %c2_92 = arith.constant 2 : index
    %296 = memref.load %arg2[%c2_92] : memref<16xf32, #tpu.memory_space<smem>>
    %297 = vector.broadcast %296 : f32 to vector<2x128xf32>
    %298 = arith.mulf %297, %246 : vector<2x128xf32>
    %299 = arith.addf %295, %298 : vector<2x128xf32>
    %c3_93 = arith.constant 3 : index
    %300 = memref.load %arg2[%c3_93] : memref<16xf32, #tpu.memory_space<smem>>
    %301 = vector.broadcast %300 : f32 to vector<2x128xf32>
    %302 = arith.mulf %301, %277 : vector<2x128xf32>
    %303 = arith.addf %299, %302 : vector<2x128xf32>
    %304 = vector.broadcast %280 : f32 to vector<2x128xf32>
    %305 = arith.mulf %304, %184 : vector<2x128xf32>
    %306 = vector.broadcast %284 : f32 to vector<2x128xf32>
    %307 = arith.mulf %306, %303 : vector<2x128xf32>
    %308 = arith.subf %305, %307 : vector<2x128xf32>
    %309 = arith.index_cast %c2_i32_84 : i32 to index
    %c0_94 = arith.constant 0 : index
    %c0_95 = arith.constant 0 : index
    %c0_96 = arith.constant 0 : index
    %310 = vector.load %arg4[%309, %c0_94, %c0_95, %c0_96] : memref<8x4x2x1xf32, #tpu.memory_space<vmem>>, vector<1x1x2x1xf32>
    %311 = vector.shape_cast %310 : vector<1x1x2x1xf32> to vector<2x1xf32>
    %312 = vector.broadcast %311 : vector<2x1xf32> to vector<2x128xf32>
    %313 = arith.addf %308, %312 : vector<2x128xf32>
    %314 = arith.index_cast %c2_i32_84 : i32 to index
    %c0_97 = arith.constant 0 : index
    %c0_98 = arith.constant 0 : index
    %c0_99 = arith.constant 0 : index
    %315 = vector.load %arg5[%314, %c0_97, %c0_98, %c0_99] : memref<8x4x2x128xf32, #tpu.memory_space<vmem>>, vector<1x1x2x128xf32>
    %316 = vector.shape_cast %315 : vector<1x1x2x128xf32> to vector<2x128xf32>
    %317 = vector.broadcast %288 : f32 to vector<2x128xf32>
    %318 = arith.mulf %317, %316 : vector<2x128xf32>
    %319 = arith.addf %313, %318 : vector<2x128xf32>
    %c4_100 = arith.constant 4 : index
    %320 = memref.load %arg2[%c4_100] : memref<16xf32, #tpu.memory_space<smem>>
    %321 = vector.broadcast %320 : f32 to vector<2x128xf32>
    %322 = arith.mulf %321, %184 : vector<2x128xf32>
    %c5_101 = arith.constant 5 : index
    %323 = memref.load %arg2[%c5_101] : memref<16xf32, #tpu.memory_space<smem>>
    %324 = vector.broadcast %323 : f32 to vector<2x128xf32>
    %325 = arith.mulf %324, %215 : vector<2x128xf32>
    %326 = arith.addf %322, %325 : vector<2x128xf32>
    %c6_102 = arith.constant 6 : index
    %327 = memref.load %arg2[%c6_102] : memref<16xf32, #tpu.memory_space<smem>>
    %328 = vector.broadcast %327 : f32 to vector<2x128xf32>
    %329 = arith.mulf %328, %246 : vector<2x128xf32>
    %330 = arith.addf %326, %329 : vector<2x128xf32>
    %c7_103 = arith.constant 7 : index
    %331 = memref.load %arg2[%c7_103] : memref<16xf32, #tpu.memory_space<smem>>
    %332 = vector.broadcast %331 : f32 to vector<2x128xf32>
    %333 = arith.mulf %332, %277 : vector<2x128xf32>
    %334 = arith.addf %330, %333 : vector<2x128xf32>
    %335 = vector.broadcast %280 : f32 to vector<2x128xf32>
    %336 = arith.mulf %335, %215 : vector<2x128xf32>
    %337 = vector.broadcast %284 : f32 to vector<2x128xf32>
    %338 = arith.mulf %337, %334 : vector<2x128xf32>
    %339 = arith.subf %336, %338 : vector<2x128xf32>
    %340 = arith.index_cast %c2_i32_84 : i32 to index
    %c1_104 = arith.constant 1 : index
    %c0_105 = arith.constant 0 : index
    %c0_106 = arith.constant 0 : index
    %341 = vector.load %arg4[%340, %c1_104, %c0_105, %c0_106] : memref<8x4x2x1xf32, #tpu.memory_space<vmem>>, vector<1x1x2x1xf32>
    %342 = vector.shape_cast %341 : vector<1x1x2x1xf32> to vector<2x1xf32>
    %343 = vector.broadcast %342 : vector<2x1xf32> to vector<2x128xf32>
    %344 = arith.addf %339, %343 : vector<2x128xf32>
    %345 = arith.index_cast %c2_i32_84 : i32 to index
    %c1_107 = arith.constant 1 : index
    %c0_108 = arith.constant 0 : index
    %c0_109 = arith.constant 0 : index
    %346 = vector.load %arg5[%345, %c1_107, %c0_108, %c0_109] : memref<8x4x2x128xf32, #tpu.memory_space<vmem>>, vector<1x1x2x128xf32>
    %347 = vector.shape_cast %346 : vector<1x1x2x128xf32> to vector<2x128xf32>
    %348 = vector.broadcast %288 : f32 to vector<2x128xf32>
    %349 = arith.mulf %348, %347 : vector<2x128xf32>
    %350 = arith.addf %344, %349 : vector<2x128xf32>
    %c8_110 = arith.constant 8 : index
    %351 = memref.load %arg2[%c8_110] : memref<16xf32, #tpu.memory_space<smem>>
    %352 = vector.broadcast %351 : f32 to vector<2x128xf32>
    %353 = arith.mulf %352, %184 : vector<2x128xf32>
    %c9_111 = arith.constant 9 : index
    %354 = memref.load %arg2[%c9_111] : memref<16xf32, #tpu.memory_space<smem>>
    %355 = vector.broadcast %354 : f32 to vector<2x128xf32>
    %356 = arith.mulf %355, %215 : vector<2x128xf32>
    %357 = arith.addf %353, %356 : vector<2x128xf32>
    %c10_112 = arith.constant 10 : index
    %358 = memref.load %arg2[%c10_112] : memref<16xf32, #tpu.memory_space<smem>>
    %359 = vector.broadcast %358 : f32 to vector<2x128xf32>
    %360 = arith.mulf %359, %246 : vector<2x128xf32>
    %361 = arith.addf %357, %360 : vector<2x128xf32>
    %c11_113 = arith.constant 11 : index
    %362 = memref.load %arg2[%c11_113] : memref<16xf32, #tpu.memory_space<smem>>
    %363 = vector.broadcast %362 : f32 to vector<2x128xf32>
    %364 = arith.mulf %363, %277 : vector<2x128xf32>
    %365 = arith.addf %361, %364 : vector<2x128xf32>
    %366 = vector.broadcast %280 : f32 to vector<2x128xf32>
    %367 = arith.mulf %366, %246 : vector<2x128xf32>
    %368 = vector.broadcast %284 : f32 to vector<2x128xf32>
    %369 = arith.mulf %368, %365 : vector<2x128xf32>
    %370 = arith.subf %367, %369 : vector<2x128xf32>
    %371 = arith.index_cast %c2_i32_84 : i32 to index
    %c2_114 = arith.constant 2 : index
    %c0_115 = arith.constant 0 : index
    %c0_116 = arith.constant 0 : index
    %372 = vector.load %arg4[%371, %c2_114, %c0_115, %c0_116] : memref<8x4x2x1xf32, #tpu.memory_space<vmem>>, vector<1x1x2x1xf32>
    %373 = vector.shape_cast %372 : vector<1x1x2x1xf32> to vector<2x1xf32>
    %374 = vector.broadcast %373 : vector<2x1xf32> to vector<2x128xf32>
    %375 = arith.addf %370, %374 : vector<2x128xf32>
    %376 = arith.index_cast %c2_i32_84 : i32 to index
    %c2_117 = arith.constant 2 : index
    %c0_118 = arith.constant 0 : index
    %c0_119 = arith.constant 0 : index
    %377 = vector.load %arg5[%376, %c2_117, %c0_118, %c0_119] : memref<8x4x2x128xf32, #tpu.memory_space<vmem>>, vector<1x1x2x128xf32>
    %378 = vector.shape_cast %377 : vector<1x1x2x128xf32> to vector<2x128xf32>
    %379 = vector.broadcast %288 : f32 to vector<2x128xf32>
    %380 = arith.mulf %379, %378 : vector<2x128xf32>
    %381 = arith.addf %375, %380 : vector<2x128xf32>
    %c12_120 = arith.constant 12 : index
    %382 = memref.load %arg2[%c12_120] : memref<16xf32, #tpu.memory_space<smem>>
    %383 = vector.broadcast %382 : f32 to vector<2x128xf32>
    %384 = arith.mulf %383, %184 : vector<2x128xf32>
    %c13_121 = arith.constant 13 : index
    %385 = memref.load %arg2[%c13_121] : memref<16xf32, #tpu.memory_space<smem>>
    %386 = vector.broadcast %385 : f32 to vector<2x128xf32>
    %387 = arith.mulf %386, %215 : vector<2x128xf32>
    %388 = arith.addf %384, %387 : vector<2x128xf32>
    %c14_122 = arith.constant 14 : index
    %389 = memref.load %arg2[%c14_122] : memref<16xf32, #tpu.memory_space<smem>>
    %390 = vector.broadcast %389 : f32 to vector<2x128xf32>
    %391 = arith.mulf %390, %246 : vector<2x128xf32>
    %392 = arith.addf %388, %391 : vector<2x128xf32>
    %c15_123 = arith.constant 15 : index
    %393 = memref.load %arg2[%c15_123] : memref<16xf32, #tpu.memory_space<smem>>
    %394 = vector.broadcast %393 : f32 to vector<2x128xf32>
    %395 = arith.mulf %394, %277 : vector<2x128xf32>
    %396 = arith.addf %392, %395 : vector<2x128xf32>
    %397 = vector.broadcast %280 : f32 to vector<2x128xf32>
    %398 = arith.mulf %397, %277 : vector<2x128xf32>
    %399 = vector.broadcast %284 : f32 to vector<2x128xf32>
    %400 = arith.mulf %399, %396 : vector<2x128xf32>
    %401 = arith.subf %398, %400 : vector<2x128xf32>
    %402 = arith.index_cast %c2_i32_84 : i32 to index
    %c3_124 = arith.constant 3 : index
    %c0_125 = arith.constant 0 : index
    %c0_126 = arith.constant 0 : index
    %403 = vector.load %arg4[%402, %c3_124, %c0_125, %c0_126] : memref<8x4x2x1xf32, #tpu.memory_space<vmem>>, vector<1x1x2x1xf32>
    %404 = vector.shape_cast %403 : vector<1x1x2x1xf32> to vector<2x1xf32>
    %405 = vector.broadcast %404 : vector<2x1xf32> to vector<2x128xf32>
    %406 = arith.addf %401, %405 : vector<2x128xf32>
    %407 = arith.index_cast %c2_i32_84 : i32 to index
    %c3_127 = arith.constant 3 : index
    %c0_128 = arith.constant 0 : index
    %c0_129 = arith.constant 0 : index
    %408 = vector.load %arg5[%407, %c3_127, %c0_128, %c0_129] : memref<8x4x2x128xf32, #tpu.memory_space<vmem>>, vector<1x1x2x128xf32>
    %409 = vector.shape_cast %408 : vector<1x1x2x128xf32> to vector<2x128xf32>
    %410 = vector.broadcast %288 : f32 to vector<2x128xf32>
    %411 = arith.mulf %410, %409 : vector<2x128xf32>
    %412 = arith.addf %406, %411 : vector<2x128xf32>
    %c3_i32_130 = arith.constant 3 : i32
    %c3_i32_131 = arith.constant 3 : i32
    %413 = arith.muli %c3_i32_131, %c3_i32_130 : i32
    %414 = arith.index_cast %413 : i32 to index
    %415 = memref.load %arg1[%414] : memref<24xf32, #tpu.memory_space<smem>>
    %c3_i32_132 = arith.constant 3 : i32
    %416 = arith.muli %c3_i32_132, %c3_i32_130 : i32
    %c1_i32_133 = arith.constant 1 : i32
    %417 = arith.addi %416, %c1_i32_133 : i32
    %418 = arith.index_cast %417 : i32 to index
    %419 = memref.load %arg1[%418] : memref<24xf32, #tpu.memory_space<smem>>
    %c3_i32_134 = arith.constant 3 : i32
    %420 = arith.muli %c3_i32_134, %c3_i32_130 : i32
    %c2_i32_135 = arith.constant 2 : i32
    %421 = arith.addi %420, %c2_i32_135 : i32
    %422 = arith.index_cast %421 : i32 to index
    %423 = memref.load %arg1[%422] : memref<24xf32, #tpu.memory_space<smem>>
    %c0_136 = arith.constant 0 : index
    %424 = memref.load %arg2[%c0_136] : memref<16xf32, #tpu.memory_space<smem>>
    %425 = vector.broadcast %424 : f32 to vector<2x128xf32>
    %426 = arith.mulf %425, %319 : vector<2x128xf32>
    %c1_137 = arith.constant 1 : index
    %427 = memref.load %arg2[%c1_137] : memref<16xf32, #tpu.memory_space<smem>>
    %428 = vector.broadcast %427 : f32 to vector<2x128xf32>
    %429 = arith.mulf %428, %350 : vector<2x128xf32>
    %430 = arith.addf %426, %429 : vector<2x128xf32>
    %c2_138 = arith.constant 2 : index
    %431 = memref.load %arg2[%c2_138] : memref<16xf32, #tpu.memory_space<smem>>
    %432 = vector.broadcast %431 : f32 to vector<2x128xf32>
    %433 = arith.mulf %432, %381 : vector<2x128xf32>
    %434 = arith.addf %430, %433 : vector<2x128xf32>
    %c3_139 = arith.constant 3 : index
    %435 = memref.load %arg2[%c3_139] : memref<16xf32, #tpu.memory_space<smem>>
    %436 = vector.broadcast %435 : f32 to vector<2x128xf32>
    %437 = arith.mulf %436, %412 : vector<2x128xf32>
    %438 = arith.addf %434, %437 : vector<2x128xf32>
    %439 = vector.broadcast %415 : f32 to vector<2x128xf32>
    %440 = arith.mulf %439, %319 : vector<2x128xf32>
    %441 = vector.broadcast %419 : f32 to vector<2x128xf32>
    %442 = arith.mulf %441, %438 : vector<2x128xf32>
    %443 = arith.subf %440, %442 : vector<2x128xf32>
    %444 = arith.index_cast %c3_i32_130 : i32 to index
    %c0_140 = arith.constant 0 : index
    %c0_141 = arith.constant 0 : index
    %c0_142 = arith.constant 0 : index
    %445 = vector.load %arg4[%444, %c0_140, %c0_141, %c0_142] : memref<8x4x2x1xf32, #tpu.memory_space<vmem>>, vector<1x1x2x1xf32>
    %446 = vector.shape_cast %445 : vector<1x1x2x1xf32> to vector<2x1xf32>
    %447 = vector.broadcast %446 : vector<2x1xf32> to vector<2x128xf32>
    %448 = arith.addf %443, %447 : vector<2x128xf32>
    %449 = arith.index_cast %c3_i32_130 : i32 to index
    %c0_143 = arith.constant 0 : index
    %c0_144 = arith.constant 0 : index
    %c0_145 = arith.constant 0 : index
    %450 = vector.load %arg5[%449, %c0_143, %c0_144, %c0_145] : memref<8x4x2x128xf32, #tpu.memory_space<vmem>>, vector<1x1x2x128xf32>
    %451 = vector.shape_cast %450 : vector<1x1x2x128xf32> to vector<2x128xf32>
    %452 = vector.broadcast %423 : f32 to vector<2x128xf32>
    %453 = arith.mulf %452, %451 : vector<2x128xf32>
    %454 = arith.addf %448, %453 : vector<2x128xf32>
    %c4_146 = arith.constant 4 : index
    %455 = memref.load %arg2[%c4_146] : memref<16xf32, #tpu.memory_space<smem>>
    %456 = vector.broadcast %455 : f32 to vector<2x128xf32>
    %457 = arith.mulf %456, %319 : vector<2x128xf32>
    %c5_147 = arith.constant 5 : index
    %458 = memref.load %arg2[%c5_147] : memref<16xf32, #tpu.memory_space<smem>>
    %459 = vector.broadcast %458 : f32 to vector<2x128xf32>
    %460 = arith.mulf %459, %350 : vector<2x128xf32>
    %461 = arith.addf %457, %460 : vector<2x128xf32>
    %c6_148 = arith.constant 6 : index
    %462 = memref.load %arg2[%c6_148] : memref<16xf32, #tpu.memory_space<smem>>
    %463 = vector.broadcast %462 : f32 to vector<2x128xf32>
    %464 = arith.mulf %463, %381 : vector<2x128xf32>
    %465 = arith.addf %461, %464 : vector<2x128xf32>
    %c7_149 = arith.constant 7 : index
    %466 = memref.load %arg2[%c7_149] : memref<16xf32, #tpu.memory_space<smem>>
    %467 = vector.broadcast %466 : f32 to vector<2x128xf32>
    %468 = arith.mulf %467, %412 : vector<2x128xf32>
    %469 = arith.addf %465, %468 : vector<2x128xf32>
    %470 = vector.broadcast %415 : f32 to vector<2x128xf32>
    %471 = arith.mulf %470, %350 : vector<2x128xf32>
    %472 = vector.broadcast %419 : f32 to vector<2x128xf32>
    %473 = arith.mulf %472, %469 : vector<2x128xf32>
    %474 = arith.subf %471, %473 : vector<2x128xf32>
    %475 = arith.index_cast %c3_i32_130 : i32 to index
    %c1_150 = arith.constant 1 : index
    %c0_151 = arith.constant 0 : index
    %c0_152 = arith.constant 0 : index
    %476 = vector.load %arg4[%475, %c1_150, %c0_151, %c0_152] : memref<8x4x2x1xf32, #tpu.memory_space<vmem>>, vector<1x1x2x1xf32>
    %477 = vector.shape_cast %476 : vector<1x1x2x1xf32> to vector<2x1xf32>
    %478 = vector.broadcast %477 : vector<2x1xf32> to vector<2x128xf32>
    %479 = arith.addf %474, %478 : vector<2x128xf32>
    %480 = arith.index_cast %c3_i32_130 : i32 to index
    %c1_153 = arith.constant 1 : index
    %c0_154 = arith.constant 0 : index
    %c0_155 = arith.constant 0 : index
    %481 = vector.load %arg5[%480, %c1_153, %c0_154, %c0_155] : memref<8x4x2x128xf32, #tpu.memory_space<vmem>>, vector<1x1x2x128xf32>
    %482 = vector.shape_cast %481 : vector<1x1x2x128xf32> to vector<2x128xf32>
    %483 = vector.broadcast %423 : f32 to vector<2x128xf32>
    %484 = arith.mulf %483, %482 : vector<2x128xf32>
    %485 = arith.addf %479, %484 : vector<2x128xf32>
    %c8_156 = arith.constant 8 : index
    %486 = memref.load %arg2[%c8_156] : memref<16xf32, #tpu.memory_space<smem>>
    %487 = vector.broadcast %486 : f32 to vector<2x128xf32>
    %488 = arith.mulf %487, %319 : vector<2x128xf32>
    %c9_157 = arith.constant 9 : index
    %489 = memref.load %arg2[%c9_157] : memref<16xf32, #tpu.memory_space<smem>>
    %490 = vector.broadcast %489 : f32 to vector<2x128xf32>
    %491 = arith.mulf %490, %350 : vector<2x128xf32>
    %492 = arith.addf %488, %491 : vector<2x128xf32>
    %c10_158 = arith.constant 10 : index
    %493 = memref.load %arg2[%c10_158] : memref<16xf32, #tpu.memory_space<smem>>
    %494 = vector.broadcast %493 : f32 to vector<2x128xf32>
    %495 = arith.mulf %494, %381 : vector<2x128xf32>
    %496 = arith.addf %492, %495 : vector<2x128xf32>
    %c11_159 = arith.constant 11 : index
    %497 = memref.load %arg2[%c11_159] : memref<16xf32, #tpu.memory_space<smem>>
    %498 = vector.broadcast %497 : f32 to vector<2x128xf32>
    %499 = arith.mulf %498, %412 : vector<2x128xf32>
    %500 = arith.addf %496, %499 : vector<2x128xf32>
    %501 = vector.broadcast %415 : f32 to vector<2x128xf32>
    %502 = arith.mulf %501, %381 : vector<2x128xf32>
    %503 = vector.broadcast %419 : f32 to vector<2x128xf32>
    %504 = arith.mulf %503, %500 : vector<2x128xf32>
    %505 = arith.subf %502, %504 : vector<2x128xf32>
    %506 = arith.index_cast %c3_i32_130 : i32 to index
    %c2_160 = arith.constant 2 : index
    %c0_161 = arith.constant 0 : index
    %c0_162 = arith.constant 0 : index
    %507 = vector.load %arg4[%506, %c2_160, %c0_161, %c0_162] : memref<8x4x2x1xf32, #tpu.memory_space<vmem>>, vector<1x1x2x1xf32>
    %508 = vector.shape_cast %507 : vector<1x1x2x1xf32> to vector<2x1xf32>
    %509 = vector.broadcast %508 : vector<2x1xf32> to vector<2x128xf32>
    %510 = arith.addf %505, %509 : vector<2x128xf32>
    %511 = arith.index_cast %c3_i32_130 : i32 to index
    %c2_163 = arith.constant 2 : index
    %c0_164 = arith.constant 0 : index
    %c0_165 = arith.constant 0 : index
    %512 = vector.load %arg5[%511, %c2_163, %c0_164, %c0_165] : memref<8x4x2x128xf32, #tpu.memory_space<vmem>>, vector<1x1x2x128xf32>
    %513 = vector.shape_cast %512 : vector<1x1x2x128xf32> to vector<2x128xf32>
    %514 = vector.broadcast %423 : f32 to vector<2x128xf32>
    %515 = arith.mulf %514, %513 : vector<2x128xf32>
    %516 = arith.addf %510, %515 : vector<2x128xf32>
    %c12_166 = arith.constant 12 : index
    %517 = memref.load %arg2[%c12_166] : memref<16xf32, #tpu.memory_space<smem>>
    %518 = vector.broadcast %517 : f32 to vector<2x128xf32>
    %519 = arith.mulf %518, %319 : vector<2x128xf32>
    %c13_167 = arith.constant 13 : index
    %520 = memref.load %arg2[%c13_167] : memref<16xf32, #tpu.memory_space<smem>>
    %521 = vector.broadcast %520 : f32 to vector<2x128xf32>
    %522 = arith.mulf %521, %350 : vector<2x128xf32>
    %523 = arith.addf %519, %522 : vector<2x128xf32>
    %c14_168 = arith.constant 14 : index
    %524 = memref.load %arg2[%c14_168] : memref<16xf32, #tpu.memory_space<smem>>
    %525 = vector.broadcast %524 : f32 to vector<2x128xf32>
    %526 = arith.mulf %525, %381 : vector<2x128xf32>
    %527 = arith.addf %523, %526 : vector<2x128xf32>
    %c15_169 = arith.constant 15 : index
    %528 = memref.load %arg2[%c15_169] : memref<16xf32, #tpu.memory_space<smem>>
    %529 = vector.broadcast %528 : f32 to vector<2x128xf32>
    %530 = arith.mulf %529, %412 : vector<2x128xf32>
    %531 = arith.addf %527, %530 : vector<2x128xf32>
    %532 = vector.broadcast %415 : f32 to vector<2x128xf32>
    %533 = arith.mulf %532, %412 : vector<2x128xf32>
    %534 = vector.broadcast %419 : f32 to vector<2x128xf32>
    %535 = arith.mulf %534, %531 : vector<2x128xf32>
    %536 = arith.subf %533, %535 : vector<2x128xf32>
    %537 = arith.index_cast %c3_i32_130 : i32 to index
    %c3_170 = arith.constant 3 : index
    %c0_171 = arith.constant 0 : index
    %c0_172 = arith.constant 0 : index
    %538 = vector.load %arg4[%537, %c3_170, %c0_171, %c0_172] : memref<8x4x2x1xf32, #tpu.memory_space<vmem>>, vector<1x1x2x1xf32>
    %539 = vector.shape_cast %538 : vector<1x1x2x1xf32> to vector<2x1xf32>
    %540 = vector.broadcast %539 : vector<2x1xf32> to vector<2x128xf32>
    %541 = arith.addf %536, %540 : vector<2x128xf32>
    %542 = arith.index_cast %c3_i32_130 : i32 to index
    %c3_173 = arith.constant 3 : index
    %c0_174 = arith.constant 0 : index
    %c0_175 = arith.constant 0 : index
    %543 = vector.load %arg5[%542, %c3_173, %c0_174, %c0_175] : memref<8x4x2x128xf32, #tpu.memory_space<vmem>>, vector<1x1x2x128xf32>
    %544 = vector.shape_cast %543 : vector<1x1x2x128xf32> to vector<2x128xf32>
    %545 = vector.broadcast %423 : f32 to vector<2x128xf32>
    %546 = arith.mulf %545, %544 : vector<2x128xf32>
    %547 = arith.addf %541, %546 : vector<2x128xf32>
    %c4_i32 = arith.constant 4 : i32
    %c3_i32_176 = arith.constant 3 : i32
    %548 = arith.muli %c3_i32_176, %c4_i32 : i32
    %549 = arith.index_cast %548 : i32 to index
    %550 = memref.load %arg1[%549] : memref<24xf32, #tpu.memory_space<smem>>
    %c3_i32_177 = arith.constant 3 : i32
    %551 = arith.muli %c3_i32_177, %c4_i32 : i32
    %c1_i32_178 = arith.constant 1 : i32
    %552 = arith.addi %551, %c1_i32_178 : i32
    %553 = arith.index_cast %552 : i32 to index
    %554 = memref.load %arg1[%553] : memref<24xf32, #tpu.memory_space<smem>>
    %c3_i32_179 = arith.constant 3 : i32
    %555 = arith.muli %c3_i32_179, %c4_i32 : i32
    %c2_i32_180 = arith.constant 2 : i32
    %556 = arith.addi %555, %c2_i32_180 : i32
    %557 = arith.index_cast %556 : i32 to index
    %558 = memref.load %arg1[%557] : memref<24xf32, #tpu.memory_space<smem>>
    %c0_181 = arith.constant 0 : index
    %559 = memref.load %arg2[%c0_181] : memref<16xf32, #tpu.memory_space<smem>>
    %560 = vector.broadcast %559 : f32 to vector<2x128xf32>
    %561 = arith.mulf %560, %454 : vector<2x128xf32>
    %c1_182 = arith.constant 1 : index
    %562 = memref.load %arg2[%c1_182] : memref<16xf32, #tpu.memory_space<smem>>
    %563 = vector.broadcast %562 : f32 to vector<2x128xf32>
    %564 = arith.mulf %563, %485 : vector<2x128xf32>
    %565 = arith.addf %561, %564 : vector<2x128xf32>
    %c2_183 = arith.constant 2 : index
    %566 = memref.load %arg2[%c2_183] : memref<16xf32, #tpu.memory_space<smem>>
    %567 = vector.broadcast %566 : f32 to vector<2x128xf32>
    %568 = arith.mulf %567, %516 : vector<2x128xf32>
    %569 = arith.addf %565, %568 : vector<2x128xf32>
    %c3_184 = arith.constant 3 : index
    %570 = memref.load %arg2[%c3_184] : memref<16xf32, #tpu.memory_space<smem>>
    %571 = vector.broadcast %570 : f32 to vector<2x128xf32>
    %572 = arith.mulf %571, %547 : vector<2x128xf32>
    %573 = arith.addf %569, %572 : vector<2x128xf32>
    %574 = vector.broadcast %550 : f32 to vector<2x128xf32>
    %575 = arith.mulf %574, %454 : vector<2x128xf32>
    %576 = vector.broadcast %554 : f32 to vector<2x128xf32>
    %577 = arith.mulf %576, %573 : vector<2x128xf32>
    %578 = arith.subf %575, %577 : vector<2x128xf32>
    %579 = arith.index_cast %c4_i32 : i32 to index
    %c0_185 = arith.constant 0 : index
    %c0_186 = arith.constant 0 : index
    %c0_187 = arith.constant 0 : index
    %580 = vector.load %arg4[%579, %c0_185, %c0_186, %c0_187] : memref<8x4x2x1xf32, #tpu.memory_space<vmem>>, vector<1x1x2x1xf32>
    %581 = vector.shape_cast %580 : vector<1x1x2x1xf32> to vector<2x1xf32>
    %582 = vector.broadcast %581 : vector<2x1xf32> to vector<2x128xf32>
    %583 = arith.addf %578, %582 : vector<2x128xf32>
    %584 = arith.index_cast %c4_i32 : i32 to index
    %c0_188 = arith.constant 0 : index
    %c0_189 = arith.constant 0 : index
    %c0_190 = arith.constant 0 : index
    %585 = vector.load %arg5[%584, %c0_188, %c0_189, %c0_190] : memref<8x4x2x128xf32, #tpu.memory_space<vmem>>, vector<1x1x2x128xf32>
    %586 = vector.shape_cast %585 : vector<1x1x2x128xf32> to vector<2x128xf32>
    %587 = vector.broadcast %558 : f32 to vector<2x128xf32>
    %588 = arith.mulf %587, %586 : vector<2x128xf32>
    %589 = arith.addf %583, %588 : vector<2x128xf32>
    %c4_191 = arith.constant 4 : index
    %590 = memref.load %arg2[%c4_191] : memref<16xf32, #tpu.memory_space<smem>>
    %591 = vector.broadcast %590 : f32 to vector<2x128xf32>
    %592 = arith.mulf %591, %454 : vector<2x128xf32>
    %c5_192 = arith.constant 5 : index
    %593 = memref.load %arg2[%c5_192] : memref<16xf32, #tpu.memory_space<smem>>
    %594 = vector.broadcast %593 : f32 to vector<2x128xf32>
    %595 = arith.mulf %594, %485 : vector<2x128xf32>
    %596 = arith.addf %592, %595 : vector<2x128xf32>
    %c6_193 = arith.constant 6 : index
    %597 = memref.load %arg2[%c6_193] : memref<16xf32, #tpu.memory_space<smem>>
    %598 = vector.broadcast %597 : f32 to vector<2x128xf32>
    %599 = arith.mulf %598, %516 : vector<2x128xf32>
    %600 = arith.addf %596, %599 : vector<2x128xf32>
    %c7_194 = arith.constant 7 : index
    %601 = memref.load %arg2[%c7_194] : memref<16xf32, #tpu.memory_space<smem>>
    %602 = vector.broadcast %601 : f32 to vector<2x128xf32>
    %603 = arith.mulf %602, %547 : vector<2x128xf32>
    %604 = arith.addf %600, %603 : vector<2x128xf32>
    %605 = vector.broadcast %550 : f32 to vector<2x128xf32>
    %606 = arith.mulf %605, %485 : vector<2x128xf32>
    %607 = vector.broadcast %554 : f32 to vector<2x128xf32>
    %608 = arith.mulf %607, %604 : vector<2x128xf32>
    %609 = arith.subf %606, %608 : vector<2x128xf32>
    %610 = arith.index_cast %c4_i32 : i32 to index
    %c1_195 = arith.constant 1 : index
    %c0_196 = arith.constant 0 : index
    %c0_197 = arith.constant 0 : index
    %611 = vector.load %arg4[%610, %c1_195, %c0_196, %c0_197] : memref<8x4x2x1xf32, #tpu.memory_space<vmem>>, vector<1x1x2x1xf32>
    %612 = vector.shape_cast %611 : vector<1x1x2x1xf32> to vector<2x1xf32>
    %613 = vector.broadcast %612 : vector<2x1xf32> to vector<2x128xf32>
    %614 = arith.addf %609, %613 : vector<2x128xf32>
    %615 = arith.index_cast %c4_i32 : i32 to index
    %c1_198 = arith.constant 1 : index
    %c0_199 = arith.constant 0 : index
    %c0_200 = arith.constant 0 : index
    %616 = vector.load %arg5[%615, %c1_198, %c0_199, %c0_200] : memref<8x4x2x128xf32, #tpu.memory_space<vmem>>, vector<1x1x2x128xf32>
    %617 = vector.shape_cast %616 : vector<1x1x2x128xf32> to vector<2x128xf32>
    %618 = vector.broadcast %558 : f32 to vector<2x128xf32>
    %619 = arith.mulf %618, %617 : vector<2x128xf32>
    %620 = arith.addf %614, %619 : vector<2x128xf32>
    %c8_201 = arith.constant 8 : index
    %621 = memref.load %arg2[%c8_201] : memref<16xf32, #tpu.memory_space<smem>>
    %622 = vector.broadcast %621 : f32 to vector<2x128xf32>
    %623 = arith.mulf %622, %454 : vector<2x128xf32>
    %c9_202 = arith.constant 9 : index
    %624 = memref.load %arg2[%c9_202] : memref<16xf32, #tpu.memory_space<smem>>
    %625 = vector.broadcast %624 : f32 to vector<2x128xf32>
    %626 = arith.mulf %625, %485 : vector<2x128xf32>
    %627 = arith.addf %623, %626 : vector<2x128xf32>
    %c10_203 = arith.constant 10 : index
    %628 = memref.load %arg2[%c10_203] : memref<16xf32, #tpu.memory_space<smem>>
    %629 = vector.broadcast %628 : f32 to vector<2x128xf32>
    %630 = arith.mulf %629, %516 : vector<2x128xf32>
    %631 = arith.addf %627, %630 : vector<2x128xf32>
    %c11_204 = arith.constant 11 : index
    %632 = memref.load %arg2[%c11_204] : memref<16xf32, #tpu.memory_space<smem>>
    %633 = vector.broadcast %632 : f32 to vector<2x128xf32>
    %634 = arith.mulf %633, %547 : vector<2x128xf32>
    %635 = arith.addf %631, %634 : vector<2x128xf32>
    %636 = vector.broadcast %550 : f32 to vector<2x128xf32>
    %637 = arith.mulf %636, %516 : vector<2x128xf32>
    %638 = vector.broadcast %554 : f32 to vector<2x128xf32>
    %639 = arith.mulf %638, %635 : vector<2x128xf32>
    %640 = arith.subf %637, %639 : vector<2x128xf32>
    %641 = arith.index_cast %c4_i32 : i32 to index
    %c2_205 = arith.constant 2 : index
    %c0_206 = arith.constant 0 : index
    %c0_207 = arith.constant 0 : index
    %642 = vector.load %arg4[%641, %c2_205, %c0_206, %c0_207] : memref<8x4x2x1xf32, #tpu.memory_space<vmem>>, vector<1x1x2x1xf32>
    %643 = vector.shape_cast %642 : vector<1x1x2x1xf32> to vector<2x1xf32>
    %644 = vector.broadcast %643 : vector<2x1xf32> to vector<2x128xf32>
    %645 = arith.addf %640, %644 : vector<2x128xf32>
    %646 = arith.index_cast %c4_i32 : i32 to index
    %c2_208 = arith.constant 2 : index
    %c0_209 = arith.constant 0 : index
    %c0_210 = arith.constant 0 : index
    %647 = vector.load %arg5[%646, %c2_208, %c0_209, %c0_210] : memref<8x4x2x128xf32, #tpu.memory_space<vmem>>, vector<1x1x2x128xf32>
    %648 = vector.shape_cast %647 : vector<1x1x2x128xf32> to vector<2x128xf32>
    %649 = vector.broadcast %558 : f32 to vector<2x128xf32>
    %650 = arith.mulf %649, %648 : vector<2x128xf32>
    %651 = arith.addf %645, %650 : vector<2x128xf32>
    %c12_211 = arith.constant 12 : index
    %652 = memref.load %arg2[%c12_211] : memref<16xf32, #tpu.memory_space<smem>>
    %653 = vector.broadcast %652 : f32 to vector<2x128xf32>
    %654 = arith.mulf %653, %454 : vector<2x128xf32>
    %c13_212 = arith.constant 13 : index
    %655 = memref.load %arg2[%c13_212] : memref<16xf32, #tpu.memory_space<smem>>
    %656 = vector.broadcast %655 : f32 to vector<2x128xf32>
    %657 = arith.mulf %656, %485 : vector<2x128xf32>
    %658 = arith.addf %654, %657 : vector<2x128xf32>
    %c14_213 = arith.constant 14 : index
    %659 = memref.load %arg2[%c14_213] : memref<16xf32, #tpu.memory_space<smem>>
    %660 = vector.broadcast %659 : f32 to vector<2x128xf32>
    %661 = arith.mulf %660, %516 : vector<2x128xf32>
    %662 = arith.addf %658, %661 : vector<2x128xf32>
    %c15_214 = arith.constant 15 : index
    %663 = memref.load %arg2[%c15_214] : memref<16xf32, #tpu.memory_space<smem>>
    %664 = vector.broadcast %663 : f32 to vector<2x128xf32>
    %665 = arith.mulf %664, %547 : vector<2x128xf32>
    %666 = arith.addf %662, %665 : vector<2x128xf32>
    %667 = vector.broadcast %550 : f32 to vector<2x128xf32>
    %668 = arith.mulf %667, %547 : vector<2x128xf32>
    %669 = vector.broadcast %554 : f32 to vector<2x128xf32>
    %670 = arith.mulf %669, %666 : vector<2x128xf32>
    %671 = arith.subf %668, %670 : vector<2x128xf32>
    %672 = arith.index_cast %c4_i32 : i32 to index
    %c3_215 = arith.constant 3 : index
    %c0_216 = arith.constant 0 : index
    %c0_217 = arith.constant 0 : index
    %673 = vector.load %arg4[%672, %c3_215, %c0_216, %c0_217] : memref<8x4x2x1xf32, #tpu.memory_space<vmem>>, vector<1x1x2x1xf32>
    %674 = vector.shape_cast %673 : vector<1x1x2x1xf32> to vector<2x1xf32>
    %675 = vector.broadcast %674 : vector<2x1xf32> to vector<2x128xf32>
    %676 = arith.addf %671, %675 : vector<2x128xf32>
    %677 = arith.index_cast %c4_i32 : i32 to index
    %c3_218 = arith.constant 3 : index
    %c0_219 = arith.constant 0 : index
    %c0_220 = arith.constant 0 : index
    %678 = vector.load %arg5[%677, %c3_218, %c0_219, %c0_220] : memref<8x4x2x128xf32, #tpu.memory_space<vmem>>, vector<1x1x2x128xf32>
    %679 = vector.shape_cast %678 : vector<1x1x2x128xf32> to vector<2x128xf32>
    %680 = vector.broadcast %558 : f32 to vector<2x128xf32>
    %681 = arith.mulf %680, %679 : vector<2x128xf32>
    %682 = arith.addf %676, %681 : vector<2x128xf32>
    %c5_i32 = arith.constant 5 : i32
    %c3_i32_221 = arith.constant 3 : i32
    %683 = arith.muli %c3_i32_221, %c5_i32 : i32
    %684 = arith.index_cast %683 : i32 to index
    %685 = memref.load %arg1[%684] : memref<24xf32, #tpu.memory_space<smem>>
    %c3_i32_222 = arith.constant 3 : i32
    %686 = arith.muli %c3_i32_222, %c5_i32 : i32
    %c1_i32_223 = arith.constant 1 : i32
    %687 = arith.addi %686, %c1_i32_223 : i32
    %688 = arith.index_cast %687 : i32 to index
    %689 = memref.load %arg1[%688] : memref<24xf32, #tpu.memory_space<smem>>
    %c3_i32_224 = arith.constant 3 : i32
    %690 = arith.muli %c3_i32_224, %c5_i32 : i32
    %c2_i32_225 = arith.constant 2 : i32
    %691 = arith.addi %690, %c2_i32_225 : i32
    %692 = arith.index_cast %691 : i32 to index
    %693 = memref.load %arg1[%692] : memref<24xf32, #tpu.memory_space<smem>>
    %c0_226 = arith.constant 0 : index
    %694 = memref.load %arg2[%c0_226] : memref<16xf32, #tpu.memory_space<smem>>
    %695 = vector.broadcast %694 : f32 to vector<2x128xf32>
    %696 = arith.mulf %695, %589 : vector<2x128xf32>
    %c1_227 = arith.constant 1 : index
    %697 = memref.load %arg2[%c1_227] : memref<16xf32, #tpu.memory_space<smem>>
    %698 = vector.broadcast %697 : f32 to vector<2x128xf32>
    %699 = arith.mulf %698, %620 : vector<2x128xf32>
    %700 = arith.addf %696, %699 : vector<2x128xf32>
    %c2_228 = arith.constant 2 : index
    %701 = memref.load %arg2[%c2_228] : memref<16xf32, #tpu.memory_space<smem>>
    %702 = vector.broadcast %701 : f32 to vector<2x128xf32>
    %703 = arith.mulf %702, %651 : vector<2x128xf32>
    %704 = arith.addf %700, %703 : vector<2x128xf32>
    %c3_229 = arith.constant 3 : index
    %705 = memref.load %arg2[%c3_229] : memref<16xf32, #tpu.memory_space<smem>>
    %706 = vector.broadcast %705 : f32 to vector<2x128xf32>
    %707 = arith.mulf %706, %682 : vector<2x128xf32>
    %708 = arith.addf %704, %707 : vector<2x128xf32>
    %709 = vector.broadcast %685 : f32 to vector<2x128xf32>
    %710 = arith.mulf %709, %589 : vector<2x128xf32>
    %711 = vector.broadcast %689 : f32 to vector<2x128xf32>
    %712 = arith.mulf %711, %708 : vector<2x128xf32>
    %713 = arith.subf %710, %712 : vector<2x128xf32>
    %714 = arith.index_cast %c5_i32 : i32 to index
    %c0_230 = arith.constant 0 : index
    %c0_231 = arith.constant 0 : index
    %c0_232 = arith.constant 0 : index
    %715 = vector.load %arg4[%714, %c0_230, %c0_231, %c0_232] : memref<8x4x2x1xf32, #tpu.memory_space<vmem>>, vector<1x1x2x1xf32>
    %716 = vector.shape_cast %715 : vector<1x1x2x1xf32> to vector<2x1xf32>
    %717 = vector.broadcast %716 : vector<2x1xf32> to vector<2x128xf32>
    %718 = arith.addf %713, %717 : vector<2x128xf32>
    %719 = arith.index_cast %c5_i32 : i32 to index
    %c0_233 = arith.constant 0 : index
    %c0_234 = arith.constant 0 : index
    %c0_235 = arith.constant 0 : index
    %720 = vector.load %arg5[%719, %c0_233, %c0_234, %c0_235] : memref<8x4x2x128xf32, #tpu.memory_space<vmem>>, vector<1x1x2x128xf32>
    %721 = vector.shape_cast %720 : vector<1x1x2x128xf32> to vector<2x128xf32>
    %722 = vector.broadcast %693 : f32 to vector<2x128xf32>
    %723 = arith.mulf %722, %721 : vector<2x128xf32>
    %724 = arith.addf %718, %723 : vector<2x128xf32>
    %c4_236 = arith.constant 4 : index
    %725 = memref.load %arg2[%c4_236] : memref<16xf32, #tpu.memory_space<smem>>
    %726 = vector.broadcast %725 : f32 to vector<2x128xf32>
    %727 = arith.mulf %726, %589 : vector<2x128xf32>
    %c5_237 = arith.constant 5 : index
    %728 = memref.load %arg2[%c5_237] : memref<16xf32, #tpu.memory_space<smem>>
    %729 = vector.broadcast %728 : f32 to vector<2x128xf32>
    %730 = arith.mulf %729, %620 : vector<2x128xf32>
    %731 = arith.addf %727, %730 : vector<2x128xf32>
    %c6_238 = arith.constant 6 : index
    %732 = memref.load %arg2[%c6_238] : memref<16xf32, #tpu.memory_space<smem>>
    %733 = vector.broadcast %732 : f32 to vector<2x128xf32>
    %734 = arith.mulf %733, %651 : vector<2x128xf32>
    %735 = arith.addf %731, %734 : vector<2x128xf32>
    %c7_239 = arith.constant 7 : index
    %736 = memref.load %arg2[%c7_239] : memref<16xf32, #tpu.memory_space<smem>>
    %737 = vector.broadcast %736 : f32 to vector<2x128xf32>
    %738 = arith.mulf %737, %682 : vector<2x128xf32>
    %739 = arith.addf %735, %738 : vector<2x128xf32>
    %740 = vector.broadcast %685 : f32 to vector<2x128xf32>
    %741 = arith.mulf %740, %620 : vector<2x128xf32>
    %742 = vector.broadcast %689 : f32 to vector<2x128xf32>
    %743 = arith.mulf %742, %739 : vector<2x128xf32>
    %744 = arith.subf %741, %743 : vector<2x128xf32>
    %745 = arith.index_cast %c5_i32 : i32 to index
    %c1_240 = arith.constant 1 : index
    %c0_241 = arith.constant 0 : index
    %c0_242 = arith.constant 0 : index
    %746 = vector.load %arg4[%745, %c1_240, %c0_241, %c0_242] : memref<8x4x2x1xf32, #tpu.memory_space<vmem>>, vector<1x1x2x1xf32>
    %747 = vector.shape_cast %746 : vector<1x1x2x1xf32> to vector<2x1xf32>
    %748 = vector.broadcast %747 : vector<2x1xf32> to vector<2x128xf32>
    %749 = arith.addf %744, %748 : vector<2x128xf32>
    %750 = arith.index_cast %c5_i32 : i32 to index
    %c1_243 = arith.constant 1 : index
    %c0_244 = arith.constant 0 : index
    %c0_245 = arith.constant 0 : index
    %751 = vector.load %arg5[%750, %c1_243, %c0_244, %c0_245] : memref<8x4x2x128xf32, #tpu.memory_space<vmem>>, vector<1x1x2x128xf32>
    %752 = vector.shape_cast %751 : vector<1x1x2x128xf32> to vector<2x128xf32>
    %753 = vector.broadcast %693 : f32 to vector<2x128xf32>
    %754 = arith.mulf %753, %752 : vector<2x128xf32>
    %755 = arith.addf %749, %754 : vector<2x128xf32>
    %c8_246 = arith.constant 8 : index
    %756 = memref.load %arg2[%c8_246] : memref<16xf32, #tpu.memory_space<smem>>
    %757 = vector.broadcast %756 : f32 to vector<2x128xf32>
    %758 = arith.mulf %757, %589 : vector<2x128xf32>
    %c9_247 = arith.constant 9 : index
    %759 = memref.load %arg2[%c9_247] : memref<16xf32, #tpu.memory_space<smem>>
    %760 = vector.broadcast %759 : f32 to vector<2x128xf32>
    %761 = arith.mulf %760, %620 : vector<2x128xf32>
    %762 = arith.addf %758, %761 : vector<2x128xf32>
    %c10_248 = arith.constant 10 : index
    %763 = memref.load %arg2[%c10_248] : memref<16xf32, #tpu.memory_space<smem>>
    %764 = vector.broadcast %763 : f32 to vector<2x128xf32>
    %765 = arith.mulf %764, %651 : vector<2x128xf32>
    %766 = arith.addf %762, %765 : vector<2x128xf32>
    %c11_249 = arith.constant 11 : index
    %767 = memref.load %arg2[%c11_249] : memref<16xf32, #tpu.memory_space<smem>>
    %768 = vector.broadcast %767 : f32 to vector<2x128xf32>
    %769 = arith.mulf %768, %682 : vector<2x128xf32>
    %770 = arith.addf %766, %769 : vector<2x128xf32>
    %771 = vector.broadcast %685 : f32 to vector<2x128xf32>
    %772 = arith.mulf %771, %651 : vector<2x128xf32>
    %773 = vector.broadcast %689 : f32 to vector<2x128xf32>
    %774 = arith.mulf %773, %770 : vector<2x128xf32>
    %775 = arith.subf %772, %774 : vector<2x128xf32>
    %776 = arith.index_cast %c5_i32 : i32 to index
    %c2_250 = arith.constant 2 : index
    %c0_251 = arith.constant 0 : index
    %c0_252 = arith.constant 0 : index
    %777 = vector.load %arg4[%776, %c2_250, %c0_251, %c0_252] : memref<8x4x2x1xf32, #tpu.memory_space<vmem>>, vector<1x1x2x1xf32>
    %778 = vector.shape_cast %777 : vector<1x1x2x1xf32> to vector<2x1xf32>
    %779 = vector.broadcast %778 : vector<2x1xf32> to vector<2x128xf32>
    %780 = arith.addf %775, %779 : vector<2x128xf32>
    %781 = arith.index_cast %c5_i32 : i32 to index
    %c2_253 = arith.constant 2 : index
    %c0_254 = arith.constant 0 : index
    %c0_255 = arith.constant 0 : index
    %782 = vector.load %arg5[%781, %c2_253, %c0_254, %c0_255] : memref<8x4x2x128xf32, #tpu.memory_space<vmem>>, vector<1x1x2x128xf32>
    %783 = vector.shape_cast %782 : vector<1x1x2x128xf32> to vector<2x128xf32>
    %784 = vector.broadcast %693 : f32 to vector<2x128xf32>
    %785 = arith.mulf %784, %783 : vector<2x128xf32>
    %786 = arith.addf %780, %785 : vector<2x128xf32>
    %c12_256 = arith.constant 12 : index
    %787 = memref.load %arg2[%c12_256] : memref<16xf32, #tpu.memory_space<smem>>
    %788 = vector.broadcast %787 : f32 to vector<2x128xf32>
    %789 = arith.mulf %788, %589 : vector<2x128xf32>
    %c13_257 = arith.constant 13 : index
    %790 = memref.load %arg2[%c13_257] : memref<16xf32, #tpu.memory_space<smem>>
    %791 = vector.broadcast %790 : f32 to vector<2x128xf32>
    %792 = arith.mulf %791, %620 : vector<2x128xf32>
    %793 = arith.addf %789, %792 : vector<2x128xf32>
    %c14_258 = arith.constant 14 : index
    %794 = memref.load %arg2[%c14_258] : memref<16xf32, #tpu.memory_space<smem>>
    %795 = vector.broadcast %794 : f32 to vector<2x128xf32>
    %796 = arith.mulf %795, %651 : vector<2x128xf32>
    %797 = arith.addf %793, %796 : vector<2x128xf32>
    %c15_259 = arith.constant 15 : index
    %798 = memref.load %arg2[%c15_259] : memref<16xf32, #tpu.memory_space<smem>>
    %799 = vector.broadcast %798 : f32 to vector<2x128xf32>
    %800 = arith.mulf %799, %682 : vector<2x128xf32>
    %801 = arith.addf %797, %800 : vector<2x128xf32>
    %802 = vector.broadcast %685 : f32 to vector<2x128xf32>
    %803 = arith.mulf %802, %682 : vector<2x128xf32>
    %804 = vector.broadcast %689 : f32 to vector<2x128xf32>
    %805 = arith.mulf %804, %801 : vector<2x128xf32>
    %806 = arith.subf %803, %805 : vector<2x128xf32>
    %807 = arith.index_cast %c5_i32 : i32 to index
    %c3_260 = arith.constant 3 : index
    %c0_261 = arith.constant 0 : index
    %c0_262 = arith.constant 0 : index
    %808 = vector.load %arg4[%807, %c3_260, %c0_261, %c0_262] : memref<8x4x2x1xf32, #tpu.memory_space<vmem>>, vector<1x1x2x1xf32>
    %809 = vector.shape_cast %808 : vector<1x1x2x1xf32> to vector<2x1xf32>
    %810 = vector.broadcast %809 : vector<2x1xf32> to vector<2x128xf32>
    %811 = arith.addf %806, %810 : vector<2x128xf32>
    %812 = arith.index_cast %c5_i32 : i32 to index
    %c3_263 = arith.constant 3 : index
    %c0_264 = arith.constant 0 : index
    %c0_265 = arith.constant 0 : index
    %813 = vector.load %arg5[%812, %c3_263, %c0_264, %c0_265] : memref<8x4x2x128xf32, #tpu.memory_space<vmem>>, vector<1x1x2x128xf32>
    %814 = vector.shape_cast %813 : vector<1x1x2x128xf32> to vector<2x128xf32>
    %815 = vector.broadcast %693 : f32 to vector<2x128xf32>
    %816 = arith.mulf %815, %814 : vector<2x128xf32>
    %817 = arith.addf %811, %816 : vector<2x128xf32>
    %c6_i32 = arith.constant 6 : i32
    %c3_i32_266 = arith.constant 3 : i32
    %818 = arith.muli %c3_i32_266, %c6_i32 : i32
    %819 = arith.index_cast %818 : i32 to index
    %820 = memref.load %arg1[%819] : memref<24xf32, #tpu.memory_space<smem>>
    %c3_i32_267 = arith.constant 3 : i32
    %821 = arith.muli %c3_i32_267, %c6_i32 : i32
    %c1_i32_268 = arith.constant 1 : i32
    %822 = arith.addi %821, %c1_i32_268 : i32
    %823 = arith.index_cast %822 : i32 to index
    %824 = memref.load %arg1[%823] : memref<24xf32, #tpu.memory_space<smem>>
    %c3_i32_269 = arith.constant 3 : i32
    %825 = arith.muli %c3_i32_269, %c6_i32 : i32
    %c2_i32_270 = arith.constant 2 : i32
    %826 = arith.addi %825, %c2_i32_270 : i32
    %827 = arith.index_cast %826 : i32 to index
    %828 = memref.load %arg1[%827] : memref<24xf32, #tpu.memory_space<smem>>
    %c0_271 = arith.constant 0 : index
    %829 = memref.load %arg2[%c0_271] : memref<16xf32, #tpu.memory_space<smem>>
    %830 = vector.broadcast %829 : f32 to vector<2x128xf32>
    %831 = arith.mulf %830, %724 : vector<2x128xf32>
    %c1_272 = arith.constant 1 : index
    %832 = memref.load %arg2[%c1_272] : memref<16xf32, #tpu.memory_space<smem>>
    %833 = vector.broadcast %832 : f32 to vector<2x128xf32>
    %834 = arith.mulf %833, %755 : vector<2x128xf32>
    %835 = arith.addf %831, %834 : vector<2x128xf32>
    %c2_273 = arith.constant 2 : index
    %836 = memref.load %arg2[%c2_273] : memref<16xf32, #tpu.memory_space<smem>>
    %837 = vector.broadcast %836 : f32 to vector<2x128xf32>
    %838 = arith.mulf %837, %786 : vector<2x128xf32>
    %839 = arith.addf %835, %838 : vector<2x128xf32>
    %c3_274 = arith.constant 3 : index
    %840 = memref.load %arg2[%c3_274] : memref<16xf32, #tpu.memory_space<smem>>
    %841 = vector.broadcast %840 : f32 to vector<2x128xf32>
    %842 = arith.mulf %841, %817 : vector<2x128xf32>
    %843 = arith.addf %839, %842 : vector<2x128xf32>
    %844 = vector.broadcast %820 : f32 to vector<2x128xf32>
    %845 = arith.mulf %844, %724 : vector<2x128xf32>
    %846 = vector.broadcast %824 : f32 to vector<2x128xf32>
    %847 = arith.mulf %846, %843 : vector<2x128xf32>
    %848 = arith.subf %845, %847 : vector<2x128xf32>
    %849 = arith.index_cast %c6_i32 : i32 to index
    %c0_275 = arith.constant 0 : index
    %c0_276 = arith.constant 0 : index
    %c0_277 = arith.constant 0 : index
    %850 = vector.load %arg4[%849, %c0_275, %c0_276, %c0_277] : memref<8x4x2x1xf32, #tpu.memory_space<vmem>>, vector<1x1x2x1xf32>
    %851 = vector.shape_cast %850 : vector<1x1x2x1xf32> to vector<2x1xf32>
    %852 = vector.broadcast %851 : vector<2x1xf32> to vector<2x128xf32>
    %853 = arith.addf %848, %852 : vector<2x128xf32>
    %854 = arith.index_cast %c6_i32 : i32 to index
    %c0_278 = arith.constant 0 : index
    %c0_279 = arith.constant 0 : index
    %c0_280 = arith.constant 0 : index
    %855 = vector.load %arg5[%854, %c0_278, %c0_279, %c0_280] : memref<8x4x2x128xf32, #tpu.memory_space<vmem>>, vector<1x1x2x128xf32>
    %856 = vector.shape_cast %855 : vector<1x1x2x128xf32> to vector<2x128xf32>
    %857 = vector.broadcast %828 : f32 to vector<2x128xf32>
    %858 = arith.mulf %857, %856 : vector<2x128xf32>
    %859 = arith.addf %853, %858 : vector<2x128xf32>
    %c4_281 = arith.constant 4 : index
    %860 = memref.load %arg2[%c4_281] : memref<16xf32, #tpu.memory_space<smem>>
    %861 = vector.broadcast %860 : f32 to vector<2x128xf32>
    %862 = arith.mulf %861, %724 : vector<2x128xf32>
    %c5_282 = arith.constant 5 : index
    %863 = memref.load %arg2[%c5_282] : memref<16xf32, #tpu.memory_space<smem>>
    %864 = vector.broadcast %863 : f32 to vector<2x128xf32>
    %865 = arith.mulf %864, %755 : vector<2x128xf32>
    %866 = arith.addf %862, %865 : vector<2x128xf32>
    %c6_283 = arith.constant 6 : index
    %867 = memref.load %arg2[%c6_283] : memref<16xf32, #tpu.memory_space<smem>>
    %868 = vector.broadcast %867 : f32 to vector<2x128xf32>
    %869 = arith.mulf %868, %786 : vector<2x128xf32>
    %870 = arith.addf %866, %869 : vector<2x128xf32>
    %c7_284 = arith.constant 7 : index
    %871 = memref.load %arg2[%c7_284] : memref<16xf32, #tpu.memory_space<smem>>
    %872 = vector.broadcast %871 : f32 to vector<2x128xf32>
    %873 = arith.mulf %872, %817 : vector<2x128xf32>
    %874 = arith.addf %870, %873 : vector<2x128xf32>
    %875 = vector.broadcast %820 : f32 to vector<2x128xf32>
    %876 = arith.mulf %875, %755 : vector<2x128xf32>
    %877 = vector.broadcast %824 : f32 to vector<2x128xf32>
    %878 = arith.mulf %877, %874 : vector<2x128xf32>
    %879 = arith.subf %876, %878 : vector<2x128xf32>
    %880 = arith.index_cast %c6_i32 : i32 to index
    %c1_285 = arith.constant 1 : index
    %c0_286 = arith.constant 0 : index
    %c0_287 = arith.constant 0 : index
    %881 = vector.load %arg4[%880, %c1_285, %c0_286, %c0_287] : memref<8x4x2x1xf32, #tpu.memory_space<vmem>>, vector<1x1x2x1xf32>
    %882 = vector.shape_cast %881 : vector<1x1x2x1xf32> to vector<2x1xf32>
    %883 = vector.broadcast %882 : vector<2x1xf32> to vector<2x128xf32>
    %884 = arith.addf %879, %883 : vector<2x128xf32>
    %885 = arith.index_cast %c6_i32 : i32 to index
    %c1_288 = arith.constant 1 : index
    %c0_289 = arith.constant 0 : index
    %c0_290 = arith.constant 0 : index
    %886 = vector.load %arg5[%885, %c1_288, %c0_289, %c0_290] : memref<8x4x2x128xf32, #tpu.memory_space<vmem>>, vector<1x1x2x128xf32>
    %887 = vector.shape_cast %886 : vector<1x1x2x128xf32> to vector<2x128xf32>
    %888 = vector.broadcast %828 : f32 to vector<2x128xf32>
    %889 = arith.mulf %888, %887 : vector<2x128xf32>
    %890 = arith.addf %884, %889 : vector<2x128xf32>
    %c8_291 = arith.constant 8 : index
    %891 = memref.load %arg2[%c8_291] : memref<16xf32, #tpu.memory_space<smem>>
    %892 = vector.broadcast %891 : f32 to vector<2x128xf32>
    %893 = arith.mulf %892, %724 : vector<2x128xf32>
    %c9_292 = arith.constant 9 : index
    %894 = memref.load %arg2[%c9_292] : memref<16xf32, #tpu.memory_space<smem>>
    %895 = vector.broadcast %894 : f32 to vector<2x128xf32>
    %896 = arith.mulf %895, %755 : vector<2x128xf32>
    %897 = arith.addf %893, %896 : vector<2x128xf32>
    %c10_293 = arith.constant 10 : index
    %898 = memref.load %arg2[%c10_293] : memref<16xf32, #tpu.memory_space<smem>>
    %899 = vector.broadcast %898 : f32 to vector<2x128xf32>
    %900 = arith.mulf %899, %786 : vector<2x128xf32>
    %901 = arith.addf %897, %900 : vector<2x128xf32>
    %c11_294 = arith.constant 11 : index
    %902 = memref.load %arg2[%c11_294] : memref<16xf32, #tpu.memory_space<smem>>
    %903 = vector.broadcast %902 : f32 to vector<2x128xf32>
    %904 = arith.mulf %903, %817 : vector<2x128xf32>
    %905 = arith.addf %901, %904 : vector<2x128xf32>
    %906 = vector.broadcast %820 : f32 to vector<2x128xf32>
    %907 = arith.mulf %906, %786 : vector<2x128xf32>
    %908 = vector.broadcast %824 : f32 to vector<2x128xf32>
    %909 = arith.mulf %908, %905 : vector<2x128xf32>
    %910 = arith.subf %907, %909 : vector<2x128xf32>
    %911 = arith.index_cast %c6_i32 : i32 to index
    %c2_295 = arith.constant 2 : index
    %c0_296 = arith.constant 0 : index
    %c0_297 = arith.constant 0 : index
    %912 = vector.load %arg4[%911, %c2_295, %c0_296, %c0_297] : memref<8x4x2x1xf32, #tpu.memory_space<vmem>>, vector<1x1x2x1xf32>
    %913 = vector.shape_cast %912 : vector<1x1x2x1xf32> to vector<2x1xf32>
    %914 = vector.broadcast %913 : vector<2x1xf32> to vector<2x128xf32>
    %915 = arith.addf %910, %914 : vector<2x128xf32>
    %916 = arith.index_cast %c6_i32 : i32 to index
    %c2_298 = arith.constant 2 : index
    %c0_299 = arith.constant 0 : index
    %c0_300 = arith.constant 0 : index
    %917 = vector.load %arg5[%916, %c2_298, %c0_299, %c0_300] : memref<8x4x2x128xf32, #tpu.memory_space<vmem>>, vector<1x1x2x128xf32>
    %918 = vector.shape_cast %917 : vector<1x1x2x128xf32> to vector<2x128xf32>
    %919 = vector.broadcast %828 : f32 to vector<2x128xf32>
    %920 = arith.mulf %919, %918 : vector<2x128xf32>
    %921 = arith.addf %915, %920 : vector<2x128xf32>
    %c12_301 = arith.constant 12 : index
    %922 = memref.load %arg2[%c12_301] : memref<16xf32, #tpu.memory_space<smem>>
    %923 = vector.broadcast %922 : f32 to vector<2x128xf32>
    %924 = arith.mulf %923, %724 : vector<2x128xf32>
    %c13_302 = arith.constant 13 : index
    %925 = memref.load %arg2[%c13_302] : memref<16xf32, #tpu.memory_space<smem>>
    %926 = vector.broadcast %925 : f32 to vector<2x128xf32>
    %927 = arith.mulf %926, %755 : vector<2x128xf32>
    %928 = arith.addf %924, %927 : vector<2x128xf32>
    %c14_303 = arith.constant 14 : index
    %929 = memref.load %arg2[%c14_303] : memref<16xf32, #tpu.memory_space<smem>>
    %930 = vector.broadcast %929 : f32 to vector<2x128xf32>
    %931 = arith.mulf %930, %786 : vector<2x128xf32>
    %932 = arith.addf %928, %931 : vector<2x128xf32>
    %c15_304 = arith.constant 15 : index
    %933 = memref.load %arg2[%c15_304] : memref<16xf32, #tpu.memory_space<smem>>
    %934 = vector.broadcast %933 : f32 to vector<2x128xf32>
    %935 = arith.mulf %934, %817 : vector<2x128xf32>
    %936 = arith.addf %932, %935 : vector<2x128xf32>
    %937 = vector.broadcast %820 : f32 to vector<2x128xf32>
    %938 = arith.mulf %937, %817 : vector<2x128xf32>
    %939 = vector.broadcast %824 : f32 to vector<2x128xf32>
    %940 = arith.mulf %939, %936 : vector<2x128xf32>
    %941 = arith.subf %938, %940 : vector<2x128xf32>
    %942 = arith.index_cast %c6_i32 : i32 to index
    %c3_305 = arith.constant 3 : index
    %c0_306 = arith.constant 0 : index
    %c0_307 = arith.constant 0 : index
    %943 = vector.load %arg4[%942, %c3_305, %c0_306, %c0_307] : memref<8x4x2x1xf32, #tpu.memory_space<vmem>>, vector<1x1x2x1xf32>
    %944 = vector.shape_cast %943 : vector<1x1x2x1xf32> to vector<2x1xf32>
    %945 = vector.broadcast %944 : vector<2x1xf32> to vector<2x128xf32>
    %946 = arith.addf %941, %945 : vector<2x128xf32>
    %947 = arith.index_cast %c6_i32 : i32 to index
    %c3_308 = arith.constant 3 : index
    %c0_309 = arith.constant 0 : index
    %c0_310 = arith.constant 0 : index
    %948 = vector.load %arg5[%947, %c3_308, %c0_309, %c0_310] : memref<8x4x2x128xf32, #tpu.memory_space<vmem>>, vector<1x1x2x128xf32>
    %949 = vector.shape_cast %948 : vector<1x1x2x128xf32> to vector<2x128xf32>
    %950 = vector.broadcast %828 : f32 to vector<2x128xf32>
    %951 = arith.mulf %950, %949 : vector<2x128xf32>
    %952 = arith.addf %946, %951 : vector<2x128xf32>
    %c7_i32 = arith.constant 7 : i32
    %c3_i32_311 = arith.constant 3 : i32
    %953 = arith.muli %c3_i32_311, %c7_i32 : i32
    %954 = arith.index_cast %953 : i32 to index
    %955 = memref.load %arg1[%954] : memref<24xf32, #tpu.memory_space<smem>>
    %c3_i32_312 = arith.constant 3 : i32
    %956 = arith.muli %c3_i32_312, %c7_i32 : i32
    %c1_i32_313 = arith.constant 1 : i32
    %957 = arith.addi %956, %c1_i32_313 : i32
    %958 = arith.index_cast %957 : i32 to index
    %959 = memref.load %arg1[%958] : memref<24xf32, #tpu.memory_space<smem>>
    %c3_i32_314 = arith.constant 3 : i32
    %960 = arith.muli %c3_i32_314, %c7_i32 : i32
    %c2_i32_315 = arith.constant 2 : i32
    %961 = arith.addi %960, %c2_i32_315 : i32
    %962 = arith.index_cast %961 : i32 to index
    %963 = memref.load %arg1[%962] : memref<24xf32, #tpu.memory_space<smem>>
    %c0_316 = arith.constant 0 : index
    %964 = memref.load %arg2[%c0_316] : memref<16xf32, #tpu.memory_space<smem>>
    %965 = vector.broadcast %964 : f32 to vector<2x128xf32>
    %966 = arith.mulf %965, %859 : vector<2x128xf32>
    %c1_317 = arith.constant 1 : index
    %967 = memref.load %arg2[%c1_317] : memref<16xf32, #tpu.memory_space<smem>>
    %968 = vector.broadcast %967 : f32 to vector<2x128xf32>
    %969 = arith.mulf %968, %890 : vector<2x128xf32>
    %970 = arith.addf %966, %969 : vector<2x128xf32>
    %c2_318 = arith.constant 2 : index
    %971 = memref.load %arg2[%c2_318] : memref<16xf32, #tpu.memory_space<smem>>
    %972 = vector.broadcast %971 : f32 to vector<2x128xf32>
    %973 = arith.mulf %972, %921 : vector<2x128xf32>
    %974 = arith.addf %970, %973 : vector<2x128xf32>
    %c3_319 = arith.constant 3 : index
    %975 = memref.load %arg2[%c3_319] : memref<16xf32, #tpu.memory_space<smem>>
    %976 = vector.broadcast %975 : f32 to vector<2x128xf32>
    %977 = arith.mulf %976, %952 : vector<2x128xf32>
    %978 = arith.addf %974, %977 : vector<2x128xf32>
    %979 = vector.broadcast %955 : f32 to vector<2x128xf32>
    %980 = arith.mulf %979, %859 : vector<2x128xf32>
    %981 = vector.broadcast %959 : f32 to vector<2x128xf32>
    %982 = arith.mulf %981, %978 : vector<2x128xf32>
    %983 = arith.subf %980, %982 : vector<2x128xf32>
    %984 = arith.index_cast %c7_i32 : i32 to index
    %c0_320 = arith.constant 0 : index
    %c0_321 = arith.constant 0 : index
    %c0_322 = arith.constant 0 : index
    %985 = vector.load %arg4[%984, %c0_320, %c0_321, %c0_322] : memref<8x4x2x1xf32, #tpu.memory_space<vmem>>, vector<1x1x2x1xf32>
    %986 = vector.shape_cast %985 : vector<1x1x2x1xf32> to vector<2x1xf32>
    %987 = vector.broadcast %986 : vector<2x1xf32> to vector<2x128xf32>
    %988 = arith.addf %983, %987 : vector<2x128xf32>
    %989 = arith.index_cast %c7_i32 : i32 to index
    %c0_323 = arith.constant 0 : index
    %c0_324 = arith.constant 0 : index
    %c0_325 = arith.constant 0 : index
    %990 = vector.load %arg5[%989, %c0_323, %c0_324, %c0_325] : memref<8x4x2x128xf32, #tpu.memory_space<vmem>>, vector<1x1x2x128xf32>
    %991 = vector.shape_cast %990 : vector<1x1x2x128xf32> to vector<2x128xf32>
    %992 = vector.broadcast %963 : f32 to vector<2x128xf32>
    %993 = arith.mulf %992, %991 : vector<2x128xf32>
    %994 = arith.addf %988, %993 : vector<2x128xf32>
    %c4_326 = arith.constant 4 : index
    %995 = memref.load %arg2[%c4_326] : memref<16xf32, #tpu.memory_space<smem>>
    %996 = vector.broadcast %995 : f32 to vector<2x128xf32>
    %997 = arith.mulf %996, %859 : vector<2x128xf32>
    %c5_327 = arith.constant 5 : index
    %998 = memref.load %arg2[%c5_327] : memref<16xf32, #tpu.memory_space<smem>>
    %999 = vector.broadcast %998 : f32 to vector<2x128xf32>
    %1000 = arith.mulf %999, %890 : vector<2x128xf32>
    %1001 = arith.addf %997, %1000 : vector<2x128xf32>
    %c6_328 = arith.constant 6 : index
    %1002 = memref.load %arg2[%c6_328] : memref<16xf32, #tpu.memory_space<smem>>
    %1003 = vector.broadcast %1002 : f32 to vector<2x128xf32>
    %1004 = arith.mulf %1003, %921 : vector<2x128xf32>
    %1005 = arith.addf %1001, %1004 : vector<2x128xf32>
    %c7_329 = arith.constant 7 : index
    %1006 = memref.load %arg2[%c7_329] : memref<16xf32, #tpu.memory_space<smem>>
    %1007 = vector.broadcast %1006 : f32 to vector<2x128xf32>
    %1008 = arith.mulf %1007, %952 : vector<2x128xf32>
    %1009 = arith.addf %1005, %1008 : vector<2x128xf32>
    %1010 = vector.broadcast %955 : f32 to vector<2x128xf32>
    %1011 = arith.mulf %1010, %890 : vector<2x128xf32>
    %1012 = vector.broadcast %959 : f32 to vector<2x128xf32>
    %1013 = arith.mulf %1012, %1009 : vector<2x128xf32>
    %1014 = arith.subf %1011, %1013 : vector<2x128xf32>
    %1015 = arith.index_cast %c7_i32 : i32 to index
    %c1_330 = arith.constant 1 : index
    %c0_331 = arith.constant 0 : index
    %c0_332 = arith.constant 0 : index
    %1016 = vector.load %arg4[%1015, %c1_330, %c0_331, %c0_332] : memref<8x4x2x1xf32, #tpu.memory_space<vmem>>, vector<1x1x2x1xf32>
    %1017 = vector.shape_cast %1016 : vector<1x1x2x1xf32> to vector<2x1xf32>
    %1018 = vector.broadcast %1017 : vector<2x1xf32> to vector<2x128xf32>
    %1019 = arith.addf %1014, %1018 : vector<2x128xf32>
    %1020 = arith.index_cast %c7_i32 : i32 to index
    %c1_333 = arith.constant 1 : index
    %c0_334 = arith.constant 0 : index
    %c0_335 = arith.constant 0 : index
    %1021 = vector.load %arg5[%1020, %c1_333, %c0_334, %c0_335] : memref<8x4x2x128xf32, #tpu.memory_space<vmem>>, vector<1x1x2x128xf32>
    %1022 = vector.shape_cast %1021 : vector<1x1x2x128xf32> to vector<2x128xf32>
    %1023 = vector.broadcast %963 : f32 to vector<2x128xf32>
    %1024 = arith.mulf %1023, %1022 : vector<2x128xf32>
    %1025 = arith.addf %1019, %1024 : vector<2x128xf32>
    %c8_336 = arith.constant 8 : index
    %1026 = memref.load %arg2[%c8_336] : memref<16xf32, #tpu.memory_space<smem>>
    %1027 = vector.broadcast %1026 : f32 to vector<2x128xf32>
    %1028 = arith.mulf %1027, %859 : vector<2x128xf32>
    %c9_337 = arith.constant 9 : index
    %1029 = memref.load %arg2[%c9_337] : memref<16xf32, #tpu.memory_space<smem>>
    %1030 = vector.broadcast %1029 : f32 to vector<2x128xf32>
    %1031 = arith.mulf %1030, %890 : vector<2x128xf32>
    %1032 = arith.addf %1028, %1031 : vector<2x128xf32>
    %c10_338 = arith.constant 10 : index
    %1033 = memref.load %arg2[%c10_338] : memref<16xf32, #tpu.memory_space<smem>>
    %1034 = vector.broadcast %1033 : f32 to vector<2x128xf32>
    %1035 = arith.mulf %1034, %921 : vector<2x128xf32>
    %1036 = arith.addf %1032, %1035 : vector<2x128xf32>
    %c11_339 = arith.constant 11 : index
    %1037 = memref.load %arg2[%c11_339] : memref<16xf32, #tpu.memory_space<smem>>
    %1038 = vector.broadcast %1037 : f32 to vector<2x128xf32>
    %1039 = arith.mulf %1038, %952 : vector<2x128xf32>
    %1040 = arith.addf %1036, %1039 : vector<2x128xf32>
    %1041 = vector.broadcast %955 : f32 to vector<2x128xf32>
    %1042 = arith.mulf %1041, %921 : vector<2x128xf32>
    %1043 = vector.broadcast %959 : f32 to vector<2x128xf32>
    %1044 = arith.mulf %1043, %1040 : vector<2x128xf32>
    %1045 = arith.subf %1042, %1044 : vector<2x128xf32>
    %1046 = arith.index_cast %c7_i32 : i32 to index
    %c2_340 = arith.constant 2 : index
    %c0_341 = arith.constant 0 : index
    %c0_342 = arith.constant 0 : index
    %1047 = vector.load %arg4[%1046, %c2_340, %c0_341, %c0_342] : memref<8x4x2x1xf32, #tpu.memory_space<vmem>>, vector<1x1x2x1xf32>
    %1048 = vector.shape_cast %1047 : vector<1x1x2x1xf32> to vector<2x1xf32>
    %1049 = vector.broadcast %1048 : vector<2x1xf32> to vector<2x128xf32>
    %1050 = arith.addf %1045, %1049 : vector<2x128xf32>
    %1051 = arith.index_cast %c7_i32 : i32 to index
    %c2_343 = arith.constant 2 : index
    %c0_344 = arith.constant 0 : index
    %c0_345 = arith.constant 0 : index
    %1052 = vector.load %arg5[%1051, %c2_343, %c0_344, %c0_345] : memref<8x4x2x128xf32, #tpu.memory_space<vmem>>, vector<1x1x2x128xf32>
    %1053 = vector.shape_cast %1052 : vector<1x1x2x128xf32> to vector<2x128xf32>
    %1054 = vector.broadcast %963 : f32 to vector<2x128xf32>
    %1055 = arith.mulf %1054, %1053 : vector<2x128xf32>
    %1056 = arith.addf %1050, %1055 : vector<2x128xf32>
    %c12_346 = arith.constant 12 : index
    %1057 = memref.load %arg2[%c12_346] : memref<16xf32, #tpu.memory_space<smem>>
    %1058 = vector.broadcast %1057 : f32 to vector<2x128xf32>
    %1059 = arith.mulf %1058, %859 : vector<2x128xf32>
    %c13_347 = arith.constant 13 : index
    %1060 = memref.load %arg2[%c13_347] : memref<16xf32, #tpu.memory_space<smem>>
    %1061 = vector.broadcast %1060 : f32 to vector<2x128xf32>
    %1062 = arith.mulf %1061, %890 : vector<2x128xf32>
    %1063 = arith.addf %1059, %1062 : vector<2x128xf32>
    %c14_348 = arith.constant 14 : index
    %1064 = memref.load %arg2[%c14_348] : memref<16xf32, #tpu.memory_space<smem>>
    %1065 = vector.broadcast %1064 : f32 to vector<2x128xf32>
    %1066 = arith.mulf %1065, %921 : vector<2x128xf32>
    %1067 = arith.addf %1063, %1066 : vector<2x128xf32>
    %c15_349 = arith.constant 15 : index
    %1068 = memref.load %arg2[%c15_349] : memref<16xf32, #tpu.memory_space<smem>>
    %1069 = vector.broadcast %1068 : f32 to vector<2x128xf32>
    %1070 = arith.mulf %1069, %952 : vector<2x128xf32>
    %1071 = arith.addf %1067, %1070 : vector<2x128xf32>
    %1072 = vector.broadcast %955 : f32 to vector<2x128xf32>
    %1073 = arith.mulf %1072, %952 : vector<2x128xf32>
    %1074 = vector.broadcast %959 : f32 to vector<2x128xf32>
    %1075 = arith.mulf %1074, %1071 : vector<2x128xf32>
    %1076 = arith.subf %1073, %1075 : vector<2x128xf32>
    %1077 = arith.index_cast %c7_i32 : i32 to index
    %c3_350 = arith.constant 3 : index
    %c0_351 = arith.constant 0 : index
    %c0_352 = arith.constant 0 : index
    %1078 = vector.load %arg4[%1077, %c3_350, %c0_351, %c0_352] : memref<8x4x2x1xf32, #tpu.memory_space<vmem>>, vector<1x1x2x1xf32>
    %1079 = vector.shape_cast %1078 : vector<1x1x2x1xf32> to vector<2x1xf32>
    %1080 = vector.broadcast %1079 : vector<2x1xf32> to vector<2x128xf32>
    %1081 = arith.addf %1076, %1080 : vector<2x128xf32>
    %1082 = arith.index_cast %c7_i32 : i32 to index
    %c3_353 = arith.constant 3 : index
    %c0_354 = arith.constant 0 : index
    %c0_355 = arith.constant 0 : index
    %1083 = vector.load %arg5[%1082, %c3_353, %c0_354, %c0_355] : memref<8x4x2x128xf32, #tpu.memory_space<vmem>>, vector<1x1x2x128xf32>
    %1084 = vector.shape_cast %1083 : vector<1x1x2x128xf32> to vector<2x128xf32>
    %1085 = vector.broadcast %963 : f32 to vector<2x128xf32>
    %1086 = arith.mulf %1085, %1084 : vector<2x128xf32>
    %1087 = arith.addf %1081, %1086 : vector<2x128xf32>
    %c8_i32 = arith.constant 8 : i32
    %cst = arith.constant -1.000000e+00 : f32
    %cst_356 = arith.constant 1.000000e+00 : f32
    %1088 = vector.broadcast %cst : f32 to vector<2x128xf32>
    %1089 = arith.maximumf %1088, %994 : vector<2x128xf32>
    %1090 = vector.broadcast %cst_356 : f32 to vector<2x128xf32>
    %1091 = arith.minimumf %1090, %1089 : vector<2x128xf32>
    %c0_357 = arith.constant 0 : index
    %c0_358 = arith.constant 0 : index
    %c0_359 = arith.constant 0 : index
    %1092 = vector.load %arg6[%c0_357, %c0_358, %c0_359] : memref<4x2x128xf32, #tpu.memory_space<vmem>>, vector<1x2x128xf32>
    %1093 = vector.shape_cast %1092 : vector<1x2x128xf32> to vector<2x128xf32>
    %1094 = vector.shape_cast %1091 : vector<2x128xf32> to vector<1x2x128xf32>
    tpu.vector_store %arg6[%c0_357, %c0_358, %c0_359], %1094 {strides = array<i32>} : memref<4x2x128xf32, #tpu.memory_space<vmem>>, vector<1x2x128xf32>,
    %cst_360 = arith.constant -1.000000e+00 : f32
    %cst_361 = arith.constant 1.000000e+00 : f32
    %1095 = vector.broadcast %cst_360 : f32 to vector<2x128xf32>
    %1096 = arith.maximumf %1095, %1025 : vector<2x128xf32>
    %1097 = vector.broadcast %cst_361 : f32 to vector<2x128xf32>
    %1098 = arith.minimumf %1097, %1096 : vector<2x128xf32>
    %c1_362 = arith.constant 1 : index
    %c0_363 = arith.constant 0 : index
    %c0_364 = arith.constant 0 : index
    %1099 = vector.load %arg6[%c1_362, %c0_363, %c0_364] : memref<4x2x128xf32, #tpu.memory_space<vmem>>, vector<1x2x128xf32>
    %1100 = vector.shape_cast %1099 : vector<1x2x128xf32> to vector<2x128xf32>
    %1101 = vector.shape_cast %1098 : vector<2x128xf32> to vector<1x2x128xf32>
    tpu.vector_store %arg6[%c1_362, %c0_363, %c0_364], %1101 {strides = array<i32>} : memref<4x2x128xf32, #tpu.memory_space<vmem>>, vector<1x2x128xf32>,
    %cst_365 = arith.constant -1.000000e+00 : f32
    %cst_366 = arith.constant 1.000000e+00 : f32
    %1102 = vector.broadcast %cst_365 : f32 to vector<2x128xf32>
    %1103 = arith.maximumf %1102, %1056 : vector<2x128xf32>
    %1104 = vector.broadcast %cst_366 : f32 to vector<2x128xf32>
    %1105 = arith.minimumf %1104, %1103 : vector<2x128xf32>
    %c2_367 = arith.constant 2 : index
    %c0_368 = arith.constant 0 : index
    %c0_369 = arith.constant 0 : index
    %1106 = vector.load %arg6[%c2_367, %c0_368, %c0_369] : memref<4x2x128xf32, #tpu.memory_space<vmem>>, vector<1x2x128xf32>
    %1107 = vector.shape_cast %1106 : vector<1x2x128xf32> to vector<2x128xf32>
    %1108 = vector.shape_cast %1105 : vector<2x128xf32> to vector<1x2x128xf32>
    tpu.vector_store %arg6[%c2_367, %c0_368, %c0_369], %1108 {strides = array<i32>} : memref<4x2x128xf32, #tpu.memory_space<vmem>>, vector<1x2x128xf32>,
    %cst_370 = arith.constant -1.000000e+00 : f32
    %cst_371 = arith.constant 1.000000e+00 : f32
    %1109 = vector.broadcast %cst_370 : f32 to vector<2x128xf32>
    %1110 = arith.maximumf %1109, %1087 : vector<2x128xf32>
    %1111 = vector.broadcast %cst_371 : f32 to vector<2x128xf32>
    %1112 = arith.minimumf %1111, %1110 : vector<2x128xf32>
    %c3_372 = arith.constant 3 : index
    %c0_373 = arith.constant 0 : index
    %c0_374 = arith.constant 0 : index
    %1113 = vector.load %arg6[%c3_372, %c0_373, %c0_374] : memref<4x2x128xf32, #tpu.memory_space<vmem>>, vector<1x2x128xf32>
    %1114 = vector.shape_cast %1113 : vector<1x2x128xf32> to vector<2x128xf32>
    %1115 = vector.shape_cast %1112 : vector<2x128xf32> to vector<1x2x128xf32>
    tpu.vector_store %arg6[%c3_372, %c0_373, %c0_374], %1115 {strides = array<i32>} : memref<4x2x128xf32, #tpu.memory_space<vmem>>, vector<1x2x128xf32>,
    return
  }
  func.func @transform_0(%arg0: i32) -> i32 {
    %c0_i32 = arith.constant 0 : i32
    %c0_i32_0 = arith.constant 0 : i32
    return %c0_i32 : i32
  }
  func.func @transform_1(%arg0: i32) -> i32 {
    %c0_i32 = arith.constant 0 : i32
    %c0_i32_0 = arith.constant 0 : i32
    return %c0_i32 : i32
  }
  func.func @transform_2(%arg0: i32) -> (i32, i32, i32) {
    %c0_i32 = arith.constant 0 : i32
    %c0_i32_0 = arith.constant 0 : i32
    %c0_i32_1 = arith.constant 0 : i32
    return %c0_i32, %c0_i32_0, %arg0 : i32, i32, i32
  }
  func.func @transform_3(%arg0: i32) -> (i32, i32, i32, i32) {
    %c0_i32 = arith.constant 0 : i32
    %c0_i32_0 = arith.constant 0 : i32
    %c0_i32_1 = arith.constant 0 : i32
    %c0_i32_2 = arith.constant 0 : i32
    %c0_i32_3 = arith.constant 0 : i32
    return %c0_i32, %c0_i32_0, %c0_i32_1, %c0_i32_2 : i32, i32, i32, i32
  }
  func.func @transform_4(%arg0: i32) -> (i32, i32, i32, i32) {
    %c0_i32 = arith.constant 0 : i32
    %c0_i32_0 = arith.constant 0 : i32
    %c0_i32_1 = arith.constant 0 : i32
    %c0_i32_2 = arith.constant 0 : i32
    return %c0_i32, %c0_i32_0, %c0_i32_1, %arg0 : i32, i32, i32, i32
  }
  func.func @transform_5(%arg0: i32) -> (i32, i32, i32) {
    %c0_i32 = arith.constant 0 : i32
    %c0_i32_0 = arith.constant 0 : i32
    %c0_i32_1 = arith.constant 0 : i32
    return %c0_i32, %c0_i32_0, %arg0 : i32, i32, i32
  }
}

</mosaic_0001>

<bundles_post_ra>
// kernel: tpu_custom_call.1
= control target key start
LH: loop header
LB: loop body
LE: loop exit
PB: predicated region body
PF: predicated region fallthrough
CT: control target
= control target key end

     0   :  { %s2147_s0 = inlined_call_operand.vmem [shape: f32[24], index: 0, kind: input, shape index: {}]   ;;  %s2148_s1 = inlined_call_operand.vmem [shape: f32[16], index: 1, kind: input, shape index: {}]   ;;  %s2149_s2 = inlined_call_operand.vmem [shape: f32[4,2,256], index: 2, kind: input, shape index: {}]   ;;  %s2150_s3 = inlined_call_operand.vmem [shape: f32[8,4,2,1], index: 3, kind: input, shape index: {}]   ;;  %s2151_s4 = inlined_call_operand.hbm [shape: f32[8,4,2,256], index: 4, kind: input, shape index: {}]   ;;  %s2152_s5 = inlined_call_operand.hbm [shape: f32[4,2,256], index: 5, kind: output, shape index: {}]  }
   0x1   :  { %2159 = sst [smem:[#allocation15_spill]] %s2147_s0 }
   0x2   :  { %10 = vsyncpa [#allocation5], 0 }
   0x3   :  { %11 = vsyncpa [#allocation7], 0 }
   0x4   :  { %12 = vsyncpa [#allocation3], 0 }
   0x5   :  { %14 = vsyncpa [#allocation3 + $0x1], 0 }
   0x6   :  { %15 = vsyncpa [#allocation4], 0 }
   0x7   :  { %17 = vsyncpa [#allocation4 + $0x1], 0  ;;  %s1645_s18 = smov 0   ;;  %s1647_s19 = smov 0  }
   0x8   :  { %s1649_s20 = smov 0   ;;  %s1651_s21 = smov 0  }
   0x9 LB: > { %s1666_s22 = sadd.s32 4294967295, %s1602_s21   ;;  %s1274_s23 = sadd.s32 4294967294, %s1602_s21   ;;  %s1602_s21 = sphi %s1651_s21, %s2181_s21   ;;  %s1598_s20 = sphi %s1649_s20, %s2180_s20   ;;  %s1594_s19 = sphi %s1647_s19, %s2179_s19   ;;  %s1590_s18 = sphi %s1645_s18, %s2178_s18  }
   0xa   : > { %s1670_s24 = sadd.s32 1, %s1602_s21   ;;  %s72_s25 = sadd.s32 1, %s1598_s20 }
   0xb   : > { %s69_s26 = ssub.s32 %s1602_s21, %s1670_s24  ;;  %p79_p0 = scmp.ne.s32.totalorder %s1598_s20, %s1594_s19 }
   0xc   : > { %p70_p1 = scmp.eq.s32.totalorder %s69_s26, 0  ;;  %p80_p2 = scmp.eq.s32.totalorder %s1602_s21, 0 }
   0xd   : > { %p132_p3 = scmp.ne.s32.totalorder %s1594_s19, %s1590_s18  ;;  %p2154_p4 = scmp.eq.s32.totalorder %s1666_s22, 0 }
   0xe   : > { %s1682_s27 = scalar_select %p70_p1, %s1598_s20, %s72_s25  }
   0xf   : > { %p1684_p5 = por %p80_p2, %p79_p0  ;;  %p1690_p6 = por %p2154_p4, %p132_p3 }
  0x10   : > { %p156_p7 = scmp.eq.s32.totalorder %s1666_s22, 1  ;;  %p162_p8 = scmp.eq.s32.totalorder %s1274_s23, 1 }
  0x11   : > { %s2160_s28 = scalar_select %p1684_p5, 1, 0 }
  0x12   : > { %s2161_s29 = scalar_select %p1690_p6, 1, 0 }
  0x13   : > { %p1275_p9 = scmp.ge.s32.totalorder %s1602_s21, 1  ;;  %p169_p10 = scmp.lt.s32.totalorder %s1602_s21, 3 }
  0x14   : > { %p1697_p11 = por %p156_p7, %p79_p0  ;;  %p1701_p12 = por %p162_p8, %p132_p3 }
  0x15   : > { %p1705_p13 = pnand %p1275_p9, %p169_p10  ;;  %s2165_s0 = sld [smem:[#allocation15_spill]] }
  0x16   : > { %s2162_s30 = scalar_select %p1697_p11, 1, 0 }
  0x17   : > { %s2163_s6 = scalar_select %p1701_p12, 1, 0 }
  0x18   : > { %s2164_s7 = scalar_select %p1705_p13, 1, 0 }
  0x19   : > { %p1415_p1 = pneg %p1705_p13  ;;  %s193_s13 = sshll.u32 %s2148_s1, 4  ;;  %s194_s13 = int_to_ptr.vmem [resolvable:$true] %s193_s13 }
  0x1b   : > { %s182_s10 = sshll.u32 %s2165_s0, 4  ;;  %p1719_p0 = pnand %p1415_p1, %p2154_p4  ;;  %s183_s10 = int_to_ptr.vmem [resolvable:$true] %s182_s10 }
  0x1c   : > { %s1474_s15 = scalar_lea.vmem %s183_s10, 16  ;;  %p1482_p9 = scmp.lt.s32.totalorder %s183_s10, %s183_s10 }
  0x1d   : > { %p1475_p2 = scmp.ne.s32.totalorder %s183_s10, %s1474_s15  ;;  %p1476_p3 = pneg %p1719_p0 }
  0x1e   : > { %p1483_p10 = scmp.lt.s32.totalorder %s1474_s15, %s1474_s15 }
  0x1f   : > { %p1477_p7 = pnand %p1476_p3, %p1475_p2 }
  0x20   : > { %p1484_p12 = por %p1483_p10, %p1482_p9 }
  0x21   : > { %p1478_p8 = pneg %p1477_p7 }
  0x23   : > { %p1485_p11 = pnand %p1484_p12, %p1478_p8 }
  0x25   : > { %1488 = shalt.err (!%p1485_p11)
}
  0x26   : > { %s1604_s16 = smov [#allocation2]   ;;  %s1489_s17 = scalar_lea.vmem %s194_s13, 16 }
  0x27   : > { %1418 = dma.vmem_to_smem (!%p1719_p0), %s183_s10, 16, %s1604_s16, [#allocation5]  }
  0x28   : > { %p1490_p1 = scmp.ne.s32.totalorder %s194_s13, %s1489_s17  ;;  %p1497_p13 = scmp.lt.s32.totalorder %s194_s13, %s194_s13 }
  0x29   : > { %p1498_p5 = scmp.lt.s32.totalorder %s1489_s17, %s1489_s17 }
  0x2a   : > { %p1492_p4 = pnand %p1490_p1, %p1476_p3 }
  0x2b   : > { %p1499_p2 = por %p1498_p5, %p1497_p13 }
  0x2c   : > { %p1493_p6 = pneg %p1492_p4 }
  0x2e   : > { %p1500_p7 = pnand %p1499_p2, %p1493_p6 }
  0x30   : > { %1503 = shalt.err (!%p1500_p7)
}
  0x31   : > { %s1605_s23 = smov [#allocation6]   ;;  %p1278_p11 = scmp.ge.s32.totalorder %s1602_s21, 2 }
  0x32   : > { %1421 = dma.vmem_to_smem (!%p1719_p0), %s194_s13, 16, %s1605_s23, [#allocation7]  }
  0x33   : > { %203 = sbr.rel (%p1278_p11) target bundleno = 88 (0x58), region = 28  ;;  %p2167_p12 = scmp.ne.s32.totalorder (!%p1278_p11), %s2160_s28, 0 }
  0x38   : > { %206 = sbr.rel (!%p2167_p12) target bundleno = 62 (0x3e), region = 32  ;;  %s208_s25 = sand.u32 (%p2167_p12), 1, %s1598_s20  }
  0x39   : > { %s1280_s26 = sshll.u32 (%p2167_p12), %s1602_s21, 1  ;;  %s1279_s8 = sshll.u32 (%p2167_p12), %s208_s25, 3 }
  0x3a   : > { %s212_s11 = scalar_lea.vmem (%p2167_p12), %s2149_s2, %s1280_s26  ;;  %s210_s12 = scalar_lea.vmem (%p2167_p12), [#allocation8], %s1279_s8 }
  0x3b   : > { %v229_v0 = vld [vmem:[%s212_s11] sm:$0x3] (%p2167_p12)  ;;  %v231_v1 = vld [vmem:[%s212_s11 + $0x4] sm:$0x3] (%p2167_p12)  ;;  %v233_v2 = vld [vmem:[%s212_s11 + $0x8] sm:$0x3] (%p2167_p12) }
  0x3c   : > { %230 = vst [vmem:[%s210_s12] sm:$0x3] (%p2167_p12), %v229_v0  ;;  %232 = vst [vmem:[%s210_s12 + $0x2] sm:$0x3] (%p2167_p12), %v231_v1  ;;  %v235_v3 = vld [vmem:[%s212_s11 + $0xc] sm:$0x3] (%p2167_p12) }
  0x3d   : > { %234 = vst [vmem:[%s210_s12 + $0x4] sm:$0x3] %v233_v2  ;;  %236 = vst [vmem:[%s210_s12 + $0x6] sm:$0x3] %v235_v3 }
  0x3e PF: > { %s269_s13 = sand.u32 1, %s1598_s20   ;;  %s1282_s14 = sshll.u32 %s1602_s21, 5 }
  0x3f   : > { %s1281_s15 = sshll.u32 %s269_s13, 6  ;;  %s1744_s23 = scalar_lea.hbm %s2151_s4, %s1282_s14 }
  0x40   : > { %s273_s25 = scalar_lea.vmem [#allocation9], %s1281_s15  ;;  %s1748_s8 = scalar_lea.sflag [#allocation3], %s269_s13 }
  0x41   : > { %s279_s26 = sshll.u32 %s273_s25, 4  ;;  %s1504_s9 = scalar_lea.hbm %s1744_s23, 1024  ;;  %s1746_s26 = int_to_ptr.vmem [resolvable:$true] %s279_s26 }
  0x42   : > { %p1505_p4 = scmp.ne.s32.totalorder %s1744_s23, %s1504_s9  ;;  %p2168_p5 = scmp.ne.s32.totalorder %s2160_s28, 0 }
  0x43   : > { %s1508_s12 = scalar_lea.hbm %s2151_s4, 2048  ;;  %p1509_p0 = scmp.lt.s32.totalorder %s1744_s23, %s2151_s4 }
  0x44   : > { %p1506_p6 = pnand %p1505_p4, %p2168_p5  ;;  %p1510_p3 = scmp.lt.s32.totalorder %s1508_s12, %s1504_s9 }
  0x46   : > { %p1507_p13 = pneg %p1506_p6  ;;  %p1511_p8 = por %p1510_p3, %p1509_p0 }
  0x48   : > { %p1512_p9 = pnand %p1511_p8, %p1507_p13 }
  0x4a   : > { %1515 = shalt.err (!%p1512_p9)
}
  0x4b   : > { %s1516_s13 = scalar_lea.vmem %s1746_s26, 1024  ;;  %s1606_s15 = smov [#allocation9]  }
  0x4c   : > { %p1517_p10 = scmp.ne.s32.totalorder %s1746_s26, %s1516_s13  ;;  %s1520_s17 = sshll.u32 %s1606_s15, 4  ;;  %s1521_s17 = int_to_ptr.vmem [resolvable:$false] %s1520_s17 }
  0x4d   : > { %s1522_s25 = scalar_lea.vmem %s1521_s17, 2048  ;;  %p1523_p7 = scmp.lt.s32.totalorder %s1746_s26, %s1521_s17 }
  0x4e   : > { %p1518_p1 = pnand %p1517_p10, %p2168_p5  ;;  %p1524_p12 = scmp.lt.s32.totalorder %s1522_s25, %s1516_s13 }
  0x50   : > { %p1519_p2 = pneg %p1518_p1  ;;  %p1525_p4 = por %p1524_p12, %p1523_p7 }
  0x52   : > { %p1526_p6 = pnand %p1525_p4, %p1519_p2 }
  0x54   : > { %1529 = shalt.err (!%p1526_p6)
}
  0x55   : > { %s1607_s9 = smov 64   ;;  %s1608_s10 = smov 32  }
  0x56   : > { %s1609_s11 = smov 2  }
  0x57   : > { %1407 = dma.hbm_to_vmem [thread:$0]  (%p2168_p5), %s1744_s23, 1024, %s1746_s26, %s1748_s8, %s1607_s9, %s1608_s10, %s1609_s11  }
  0x58 PF: > { %p2169_p13 = scmp.ne.s32.totalorder %s2164_s7, 0 }
  0x59   : > { %p2170_p0 = scmp.eq.s32.totalorder (!%p2169_p13), %s1666_s22, 0 }
  0x5a   : > { %291 = sbr.rel (%p2169_p13) target bundleno = 375 (0x177), region = 77 }
  0x5f   : > { %1573 = dma.done.wait (%p2170_p0), [#allocation5], 16   ;;  %p2171_p3 = pmov %p2170_p0 }
  0x60   : > { %p2172_p8 = pmov %p2170_p0 }
  0x61   : > { %1575 = vsyncadd (%p2171_p3), [#allocation5], 4294967280 }
  0x62   : > { %1577 = dma.done.wait (%p2172_p8), [#allocation7], 16   ;;  %p2173_p9 = pmov %p2170_p0 }
  0x63   : > { %s1782_s28 = sand.u32 1, %s1594_s19   ;;  %p2174_p5 = scmp.ne.s32.totalorder %s2161_s29, 0 }
  0x64   : > { %1579 = vsyncadd (%p2173_p9), [#allocation7], 4294967280  ;;  %s2158_s7 = sshll.u32 %s1782_s28, 3  ;;  %s1287_s23 = sshll.u32 %s1782_s28, 6 }
  0x65   : > { %s1788_s26 = scalar_lea.vmem [#allocation8], %s2158_s7  ;;  %s309_s8 = scalar_lea.sflag [#allocation3], %s1782_s28 }
  0x66   : > { %s1791_s12 = scalar_lea.vmem [#allocation9], %s1287_s23 }
  0x67   : > { %1581 = dma.done.wait (%p2174_p5), %s309_s8, 1024  }
  0x68   : > { %1583 = vsyncadd (%p2174_p5), %s309_s8, 4294966272 }
  0x69   : > { %317 = sfence }
  0x6a   : > { %v1307_v4 = vld [vmem:[%s2150_s3 + $0x4] sm:$0x3]  ;;  %v374_v5 = vld [vmem:[%s2150_s3] sm:$0x3]  ;;  %v1610_v6 = vmov 0   ;;  %s1303_s17 = sld [smem:[#allocation6 + $0x8]] }
  0x6b   : > { %1473 = vset.pattern.permute.xlu1 %v1610_v6  ;;  %1472 = vset.pattern.permute.xlu0 %v1610_v6  ;;  %v1313_v7 = vld [vmem:[%s2150_s3 + $0x6] sm:$0x3]  ;;  %v1301_v8 = vld [vmem:[%s2150_s3 + $0x2] sm:$0x3]  ;;  %v1320_v9 = vld [vmem:[%s2150_s3 + $0xa] sm:$0x3] }
  0x6c   : > { %437 = vperm.xlu1 %1473, %v1307_v4   ;;  %377 = vperm.xlu0 %1472, %v374_v5   ;;  %v1318_v10 = vld [vmem:[%s2150_s3 + $0x8] sm:$0x3]  ;;  %v1324_v11 = vld [vmem:[%s2150_s3 + $0xe] sm:$0x3]  ;;  %v1322_v12 = vld [vmem:[%s2150_s3 + $0xc] sm:$0x3] }
  0x6d   : > { %v1331_v13 = vld [vmem:[%s2150_s3 + $0x12] sm:$0x3]  ;;  %v1329_v14 = vld [vmem:[%s2150_s3 + $0x10] sm:$0x3]  ;;  %v1335_v15 = vld [vmem:[%s2150_s3 + $0x16] sm:$0x3] }
  0x6e   : > { %v1333_v16 = vld [vmem:[%s2150_s3 + $0x14] sm:$0x3]  ;;  %v1342_v17 = vld [vmem:[%s2150_s3 + $0x1a] sm:$0x3]  ;;  %v1340_v18 = vld [vmem:[%s2150_s3 + $0x18] sm:$0x3] }
  0x6f   : > { %v1346_v19 = vld [vmem:[%s2150_s3 + $0x1e] sm:$0x3]  ;;  %v1344_v20 = vld [vmem:[%s2150_s3 + $0x1c] sm:$0x3]  ;;  %v1353_v21 = vld [vmem:[%s2150_s3 + $0x22] sm:$0x3] }
  0x70   : > { %467 = vperm.xlu1 %1473, %v1313_v7   ;;  %407 = vperm.xlu0 %1472, %v1301_v8   ;;  %v1351_v22 = vld [vmem:[%s2150_s3 + $0x20] sm:$0x3]  ;;  %v1357_v23 = vld [vmem:[%s2150_s3 + $0x26] sm:$0x3]  ;;  %v1355_v24 = vld [vmem:[%s2150_s3 + $0x24] sm:$0x3]  ;;  %v1901_v41 = vstv %s1303_s17 }
  0x71   : > { %v1364_v25 = vld [vmem:[%s2150_s3 + $0x2a] sm:$0x3]  ;;  %v1362_v26 = vld [vmem:[%s2150_s3 + $0x28] sm:$0x3]  ;;  %v1368_v27 = vld [vmem:[%s2150_s3 + $0x2e] sm:$0x3] }
  0x72   : > { %v1366_v28 = vld [vmem:[%s2150_s3 + $0x2c] sm:$0x3]  ;;  %v1375_v29 = vld [vmem:[%s2150_s3 + $0x32] sm:$0x3]  ;;  %v1373_v30 = vld [vmem:[%s2150_s3 + $0x30] sm:$0x3] }
  0x73   : > { %v1379_v31 = vld [vmem:[%s2150_s3 + $0x36] sm:$0x3]  ;;  %v1377_v32 = vld [vmem:[%s2150_s3 + $0x34] sm:$0x3]  ;;  %v1386_v33 = vld [vmem:[%s2150_s3 + $0x3a] sm:$0x3] }
  0x74   : > { %517 = vperm.xlu1 %1473, %v1320_v9   ;;  %494 = vperm.xlu0 %1472, %v1318_v10   ;;  %v1384_v34 = vld [vmem:[%s2150_s3 + $0x38] sm:$0x3]  ;;  %v1390_v35 = vld [vmem:[%s2150_s3 + $0x3e] sm:$0x3]  ;;  %v1388_v36 = vld [vmem:[%s2150_s3 + $0x3c] sm:$0x3] }
  0x75   : > { %s1304_s25 = sld [smem:[#allocation6 + $0x9]]  ;;  %v344_v37 = vld [vmem:[%s1788_s26] sm:$0x3]  ;;  %v1895_v38 = vld [vmem:[%s1788_s26 + $0x2] sm:$0x3]  ;;  %p2176_p1 = scmp.ne.s32.totalorder %s2162_s30, 0 }
  0x76   : > { %s354_s29 = sld [smem:[#allocation6]]  ;;  %v1290_v45 = vld [vmem:[%s1788_s26 + $0x4] sm:$0x3]  ;;  %v417_v46 = vmul.f32 %v1901_v41, %v344_v37  ;;  %v1291_v57 = vld [vmem:[%s1788_s26 + $0x6] sm:$0x3] }
  0x77   : > { %s1294_s9 = sld [smem:[#allocation6 + $0x1]] }
  0x78   : > { %561 = vperm.xlu1 %1473, %v1324_v11   ;;  %539 = vperm.xlu0 %1472, %v1322_v12   ;;  %s1295_s10 = sld [smem:[#allocation6 + $0x2]] }
  0x79   : > { %s1309_s11 = sld [smem:[#allocation6 + $0xc]] }
  0x7a   : > { %s1310_s23 = sld [smem:[#allocation6 + $0xd]] }
  0x7b   : > { %s1297_s8 = sld [smem:[#allocation6 + $0x4]]  ;;  %v1903_v42 = vstv %s1304_s25 }
  0x7c   : > { %611 = vperm.xlu1 %1473, %v1331_v13   ;;  %588 = vperm.xlu0 %1472, %v1329_v14   ;;  %s1298_s7 = sld [smem:[#allocation6 + $0x5]]  ;;  %v1897_v39 = vstv %s354_s29  ;;  %v420_v47 = vmul.f32 %v1895_v38, %v1903_v42 }
  0x7d   : > { %s1305_s14 = sld [smem:[#allocation6 + $0xa]]  ;;  %v1899_v40 = vstv %s1294_s9  ;;  %v356_v43 = vmul.f32 %v1897_v39, %v344_v37 }
  0x7e   : > { %s1296_s16 = sld [smem:[#allocation6 + $0x3]]  ;;  %v359_v44 = vmul.f32 %v1895_v38, %v1899_v40  ;;  %v1912_v48 = vstv %s1295_s10  ;;  %v421_v62 = vadd.f32 %v420_v47, %v417_v46  ;;  %v1314_v47 = vld [vmem:[%s1791_s12 + $0x6] sm:$0x3] }
  0x7f   : > { %s1311_s13 = sld [smem:[#allocation6 + $0xe]]  ;;  %v1914_v49 = vstv %s1309_s11  ;;  %v363_v55 = vmul.f32 %v1290_v45, %v1912_v48 }
  0x80   : > { %655 = vperm.xlu1 %1473, %v1335_v15   ;;  %633 = vperm.xlu0 %1472, %v1333_v16   ;;  %s1299_s15 = sld [smem:[#allocation6 + $0x6]]  ;;  %v1916_v50 = vstv %s1310_s23  ;;  %v360_v54 = vadd.f32 %v359_v44, %v356_v43  ;;  %v447_v58 = vmul.f32 %v1914_v49, %v344_v37 }
  0x81   : > { %s1306_s0 = sld [smem:[#allocation6 + $0xb]]  ;;  %v1918_v51 = vstv %s1297_s8  ;;  %v450_v59 = vmul.f32 %v1895_v38, %v1916_v50 }
  0x82   : > { %s1312_s17 = sld [smem:[#allocation6 + $0xf]]  ;;  %v1920_v52 = vstv %s1298_s7  ;;  %v387_v60 = vmul.f32 %v1918_v51, %v344_v37  ;;  %v364_v3 = vadd.f32 %v363_v55, %v360_v54 }
  0x83   : > { %s1300_s25 = sld [smem:[#allocation6 + $0x7]]  ;;  %v1922_v53 = vstv %s1305_s14  ;;  %v390_v61 = vmul.f32 %v1895_v38, %v1920_v52  ;;  %v451_v5 = vadd.f32 %v450_v59, %v447_v58 }
  0x84   : > { %705 = vperm.xlu1 %1473, %v1342_v17   ;;  %682 = vperm.xlu0 %1472, %v1340_v18   ;;  %v1925_v56 = vstv %s1296_s16  ;;  %s351_s29 = sld [smem:[#allocation2]]  ;;  %v424_v63 = vmul.f32 %v1290_v45, %v1922_v53 }
  0x85   : > { %s1292_s7 = sld [smem:[#allocation2 + $0x1]]  ;;  %v1935_v0 = vstv %s1311_s13  ;;  %v367_v4 = vmul.f32 %v1291_v57, %v1925_v56  ;;  %v391_v7 = vadd.f32 %v390_v61, %v387_v60 }
  0x86   : > { %v1937_v1 = vstv %s1299_s15  ;;  %v454_v6 = vmul.f32 %v1290_v45, %v1935_v0  ;;  %v425_v9 = vadd.f32 %v424_v63, %v421_v62  ;;  %s1315_s26 = sld [smem:[#allocation2 + $0x3]] }
  0x87   : > { %v1939_v2 = vstv %s1306_s0  ;;  %v394_v8 = vmul.f32 %v1290_v45, %v1937_v1  ;;  %v368_v13 = vadd.f32 %v367_v4, %v364_v3  ;;  %s1293_s0 = sld [smem:[#allocation2 + $0x2]] }
  0x88   : > { %749 = vperm.xlu1 %1473, %v1346_v19   ;;  %727 = vperm.xlu0 %1472, %v1344_v20   ;;  %v428_v10 = vmul.f32 %v1291_v57, %v1939_v2  ;;  %v1945_v11 = vstv %s1312_s17  ;;  %v455_v14 = vadd.f32 %v454_v6, %v451_v5  ;;  %s1316_s9 = sld [smem:[#allocation2 + $0x4]] }
  0x89   : > { %v1947_v12 = vstv %s1300_s25  ;;  %v458_v15 = vmul.f32 %v1291_v57, %v1945_v11  ;;  %v395_v16 = vadd.f32 %v394_v8, %v391_v7  ;;  %s1317_s10 = sld [smem:[#allocation2 + $0x5]] }
  0x8a   : > { %v398_v17 = vmul.f32 %v1291_v57, %v1947_v12  ;;  %v369_v18 = vstv %s351_s29  ;;  %v429_v20 = vadd.f32 %v428_v10, %v425_v9  ;;  %s1326_s11 = sld [smem:[#allocation2 + $0x6]] }
  0x8b   : > { %v371_v19 = vstv %s1292_s7  ;;  %s1327_s23 = sld [smem:[#allocation2 + $0x7]] }
  0x8c   : > { %799 = vperm.xlu1 %1473, %v1353_v21   ;;  %776 = vperm.xlu0 %1472, %v1351_v22   ;;  %v370_v21 = vmul.f32 %v369_v18, %v344_v37  ;;  %v372_v22 = vmul.f32 %v371_v19, %v368_v13  ;;  %v1302_v37 = vld [vmem:[%s1791_s12 + $0x2] sm:$0x3]  ;;  %v485_v6 = vstv %s1315_s26  ;;  %s1328_s8 = sld [smem:[#allocation2 + $0x8]] }
  0x8d   : > { %s1337_s14 = sld [smem:[#allocation2 + $0x9]] }
  0x8e   : > { %s1338_s16 = sld [smem:[#allocation2 + $0xa]] }
  0x8f   : > { %s1339_s13 = sld [smem:[#allocation2 + $0xb]] }
  0x90   : > { %843 = vperm.xlu1 %1473, %v1357_v23   ;;  %821 = vperm.xlu0 %1472, %v1355_v24   ;;  %v459_v23 = vadd.f32 %v458_v15, %v455_v14  ;;  %v399_v24 = vadd.f32 %v398_v17, %v395_v16  ;;  %s1348_s15 = sld [smem:[#allocation2 + $0xc]] }
  0x91   : > { %s1349_s17 = sld [smem:[#allocation2 + $0xd]] }
  0x92   : > { %s1350_s25 = sld [smem:[#allocation2 + $0xe]] }
  0x93   : > { %s1359_s29 = sld [smem:[#allocation2 + $0xf]] }
  0x94   : > { %893 = vperm.xlu1 %1473, %v1364_v25   ;;  %870 = vperm.xlu0 %1472, %v1362_v26   ;;  %v430_v25 = vmul.f32 %v1290_v45, %v369_v18  ;;  %v431_v26 = vmul.f32 %v429_v20, %v371_v19  ;;  %s1360_s7 = sld [smem:[#allocation2 + $0x10]] }
  0x95   : > { %s1370_s26 = sld [smem:[#allocation2 + $0x12]] }
  0x98   : > { %937 = vperm.xlu1 %1473, %v1368_v27   ;;  %915 = vperm.xlu0 %1472, %v1366_v28   ;;  %v460_v27 = vmul.f32 %v1291_v57, %v369_v18  ;;  %v373_v28 = vsub.f32 %v370_v21, %v372_v22 }
  0x9c   : > { %987 = vperm.xlu1 %1473, %v1375_v29   ;;  %964 = vperm.xlu0 %1472, %v1373_v30   ;;  %v461_v29 = vmul.f32 %v459_v23, %v371_v19  ;;  %v400_v30 = vmul.f32 %v1895_v38, %v369_v18 }
  0x9e   : > { %v462_v45 = vsub.f32 %v460_v27, %v461_v29  ;;  %v487_v29 = vstv %s1316_s9  ;;  %s1371_s9 = sld [smem:[#allocation2 + $0x13]] }
  0xa0   : > { %1031 = vperm.xlu1 %1473, %v1379_v31   ;;  %1009 = vperm.xlu0 %1472, %v1377_v32   ;;  %v401_v31 = vmul.f32 %v399_v24, %v371_v19  ;;  %v382_v32 = vstv %s1293_s0  ;;  %s1361_s0 = sld [smem:[#allocation2 + $0x11]] }
  0xa1   : > { %v413_v58 = vmul.f32 %v1302_v37, %v382_v32  ;;  %v473_v60 = vmul.f32 %v1314_v47, %v382_v32 }
  0xa2   : > { %v402_v54 = vsub.f32 %v400_v30, %v401_v31  ;;  %v500_v30 = vstv %s1317_s10  ;;  %s1372_s10 = sld [smem:[#allocation2 + $0x14]] }
  0xa4   : > { %1081 = vperm.xlu1 %1473, %v1386_v33   ;;  %1058 = vperm.xlu0 %1472, %v1384_v34   ;;  %v432_v33 = vsub.f32 %v430_v25, %v431_v26  ;;  %v381_v34 = vld [vmem:[%s1791_s12] sm:$0x3] }
  0xa5   : > { %v383_v46 = vmul.f32 %v382_v32, %v381_v34 }
  0xa8   : > { %1125 = vperm.xlu1 %1473, %v1390_v35   ;;  %1103 = vperm.xlu0 %1472, %v1388_v36   ;;  %v1308_v35 = vld [vmem:[%s1791_s12 + $0x4] sm:$0x3] }
  0xa9   : > { %v443_v57 = vmul.f32 %v1308_v35, %v382_v32 }
  0xe7   : > { %v438_v36 = vpop.permute.xlu1 %437  ;;  %v378_v43 = vpop.permute.xlu0 %377 }
  0xe8   : > { %v380_v44 = vadd.f32 %v378_v43, %v373_v28  ;;  %v440_v55 = vadd.f32 %v438_v36, %v432_v33  ;;  %v1321_v33 = vld [vmem:[%s1791_s12 + $0xa] sm:$0x3]  ;;  %v1319_v36 = vld [vmem:[%s1791_s12 + $0x8] sm:$0x3] }
  0xea   : > { %v384_v61 = vadd.f32 %v383_v46, %v380_v44  ;;  %v444_v3 = vadd.f32 %v443_v57, %v440_v55 }
  0xeb   : > { %v468_v59 = vpop.permute.xlu1 %467  ;;  %v408_v38 = vpop.permute.xlu0 %407 }
  0xec   : > { %v470_v62 = vadd.f32 %v468_v59, %v462_v45  ;;  %v410_v63 = vadd.f32 %v408_v38, %v402_v54  ;;  %v503_v7 = vmul.f32 %v1918_v51, %v384_v61  ;;  %v478_v9 = vmul.f32 %v384_v61, %v1897_v39 }
  0xed   : > { %v506_v13 = vmul.f32 %v444_v3, %v1937_v1  ;;  %v481_v14 = vmul.f32 %v444_v3, %v1912_v48  ;;  %v547_v15 = vmul.f32 %v1914_v49, %v384_v61  ;;  %v525_v19 = vmul.f32 %v1901_v41, %v384_v61 }
  0xee   : > { %v414_v4 = vadd.f32 %v413_v58, %v410_v63  ;;  %v474_v5 = vadd.f32 %v473_v60, %v470_v62  ;;  %v550_v23 = vmul.f32 %v1935_v0, %v444_v3  ;;  %v528_v24 = vmul.f32 %v444_v3, %v1922_v53  ;;  %v1325_v58 = vld [vmem:[%s1791_s12 + $0xe] sm:$0x3] }
  0xef   : > { %v518_v34 = vpop.permute.xlu1 %517  ;;  %v495_v46 = vpop.permute.xlu0 %494  ;;  %v486_v47 = vmul.f32 %v485_v6, %v384_v61  ;;  %v523_v60 = vmul.f32 %v1321_v33, %v500_v30  ;;  %v501_v38 = vmul.f32 %v1319_v36, %v500_v30 }
  0xf0   : > { %v504_v8 = vmul.f32 %v414_v4, %v1920_v52  ;;  %v479_v10 = vmul.f32 %v414_v4, %v1899_v40  ;;  %v548_v16 = vmul.f32 %v1916_v50, %v414_v4  ;;  %v526_v20 = vmul.f32 %v1903_v42, %v414_v4 }
  0xf1   : > { %v508_v21 = vmul.f32 %v474_v5, %v1947_v12  ;;  %v483_v27 = vmul.f32 %v474_v5, %v1925_v56  ;;  %v552_v32 = vmul.f32 %v474_v5, %v1945_v11  ;;  %v530_v44 = vmul.f32 %v474_v5, %v1939_v2 }
  0xf2   : > { %v505_v17 = vadd.f32 %v504_v8, %v503_v7  ;;  %v480_v18 = vadd.f32 %v479_v10, %v478_v9  ;;  %v549_v22 = vadd.f32 %v548_v16, %v547_v15  ;;  %v527_v28 = vadd.f32 %v526_v20, %v525_v19  ;;  %v1323_v7 = vld [vmem:[%s1791_s12 + $0xc] sm:$0x3] }
  0xf3   : > { %v510_v54 = vmul.f32 %v485_v6, %v414_v4  ;;  %v554_v62 = vmul.f32 %v485_v6, %v474_v5  ;;  %v532_v10 = vmul.f32 %v485_v6, %v444_v3  ;;  %v562_v4 = vpop.permute.xlu1 %561  ;;  %v540_v20 = vpop.permute.xlu0 %539 }
  0xf4   : > { %v507_v25 = vadd.f32 %v506_v13, %v505_v17  ;;  %v482_v26 = vadd.f32 %v481_v14, %v480_v18  ;;  %v551_v31 = vadd.f32 %v550_v23, %v549_v22  ;;  %v529_v37 = vadd.f32 %v528_v24, %v527_v28 }
  0xf5   : > { %v567_v14 = vmul.f32 %v1325_v58, %v500_v30  ;;  %v545_v17 = vmul.f32 %v1323_v7, %v500_v30  ;;  %v581_v28 = vstv %s1327_s23  ;;  %v1332_v58 = vld [vmem:[%s1791_s12 + $0x12] sm:$0x3]  ;;  %s1382_s23 = sld [smem:[#allocation2 + $0x16]] }
  0xf6   : > { %v509_v35 = vadd.f32 %v508_v21, %v507_v25  ;;  %v484_v43 = vadd.f32 %v483_v27, %v482_v26  ;;  %v553_v45 = vadd.f32 %v552_v32, %v551_v31  ;;  %v531_v59 = vadd.f32 %v530_v44, %v529_v37 }
  0xf7   : > { %v579_v27 = vstv %s1326_s11  ;;  %v612_v7 = vpop.permute.xlu1 %611  ;;  %s1381_s11 = sld [smem:[#allocation2 + $0x15]] }
  0xf8   : > { %v511_v55 = vmul.f32 %v509_v35, %v487_v29  ;;  %v488_v57 = vmul.f32 %v487_v29, %v484_v43  ;;  %v555_v63 = vmul.f32 %v553_v45, %v487_v29  ;;  %v533_v13 = vmul.f32 %v531_v59, %v487_v29  ;;  %v1330_v59 = vld [vmem:[%s1791_s12 + $0x10] sm:$0x3] }
  0xfa   : > { %v512_v8 = vsub.f32 %v510_v54, %v511_v55  ;;  %v489_v9 = vsub.f32 %v486_v47, %v488_v57  ;;  %v556_v15 = vsub.f32 %v554_v62, %v555_v63  ;;  %v534_v18 = vsub.f32 %v532_v10, %v533_v13 }
  0xfb   : > { %v594_v54 = vstv %s1328_s8  ;;  %s1383_s8 = sld [smem:[#allocation2 + $0x17]] }
  0xfc   : > { %v520_v61 = vadd.f32 %v518_v34, %v512_v8  ;;  %v497_v16 = vadd.f32 %v495_v46, %v489_v9  ;;  %v564_v19 = vadd.f32 %v562_v4, %v556_v15  ;;  %v542_v5 = vadd.f32 %v540_v20, %v534_v18  ;;  %v589_v18 = vpop.permute.xlu0 %588  ;;  %v1336_v20 = vld [vmem:[%s1791_s12 + $0x16] sm:$0x3] }
  0xfe   : > { %v524_v21 = vadd.f32 %v523_v60, %v520_v61  ;;  %v502_v22 = vadd.f32 %v501_v38, %v497_v16  ;;  %v568_v23 = vadd.f32 %v567_v14, %v564_v19  ;;  %v546_v24 = vadd.f32 %v545_v17, %v542_v5 }
  0xff   : > { %v617_v16 = vmul.f32 %v1332_v58, %v594_v54  ;;  %v595_v17 = vmul.f32 %v1330_v59, %v594_v54 }
 0x100   : > { %v597_v25 = vmul.f32 %v502_v22, %v1918_v51  ;;  %v598_v3 = vmul.f32 %v524_v21, %v1920_v52  ;;  %v572_v6 = vmul.f32 %v502_v22, %v1897_v39  ;;  %v573_v26 = vmul.f32 %v524_v21, %v1899_v40 }
 0x101   : > { %v600_v30 = vmul.f32 %v546_v24, %v1937_v1  ;;  %v575_v32 = vmul.f32 %v546_v24, %v1912_v48  ;;  %v641_v33 = vmul.f32 %v502_v22, %v1914_v49  ;;  %v642_v34 = vmul.f32 %v524_v21, %v1916_v50 }
 0x102   : > { %v599_v29 = vadd.f32 %v598_v3, %v597_v25  ;;  %v574_v31 = vadd.f32 %v573_v26, %v572_v6  ;;  %v602_v36 = vmul.f32 %v568_v23, %v1947_v12  ;;  %v577_v43 = vmul.f32 %v568_v23, %v1925_v56  ;;  %v1334_v26 = vld [vmem:[%s1791_s12 + $0x14] sm:$0x3] }
 0x103   : > { %v619_v37 = vmul.f32 %v502_v22, %v1901_v41  ;;  %v643_v46 = vadd.f32 %v642_v34, %v641_v33  ;;  %v644_v47 = vmul.f32 %v546_v24, %v1935_v0  ;;  %v620_v45 = vmul.f32 %v524_v21, %v1903_v42  ;;  %v656_v33 = vpop.permute.xlu1 %655 }
 0x104   : > { %v601_v35 = vadd.f32 %v600_v30, %v599_v29  ;;  %v576_v44 = vadd.f32 %v575_v32, %v574_v31  ;;  %v646_v57 = vmul.f32 %v568_v23, %v1945_v11  ;;  %v622_v63 = vmul.f32 %v546_v24, %v1922_v53 }
 0x105   : > { %v645_v38 = vadd.f32 %v644_v47, %v643_v46  ;;  %v621_v62 = vadd.f32 %v620_v45, %v619_v37  ;;  %v604_v8 = vmul.f32 %v579_v27, %v524_v21  ;;  %v580_v10 = vmul.f32 %v579_v27, %v502_v22  ;;  %v634_v37 = vpop.permute.xlu0 %633 }
 0x106   : > { %v603_v55 = vadd.f32 %v602_v36, %v601_v35  ;;  %v578_v60 = vadd.f32 %v577_v43, %v576_v44  ;;  %v624_v61 = vmul.f32 %v568_v23, %v1939_v2  ;;  %v648_v5 = vmul.f32 %v579_v27, %v568_v23 }
 0x107   : > { %v647_v14 = vadd.f32 %v646_v57, %v645_v38  ;;  %v623_v15 = vadd.f32 %v622_v63, %v621_v62  ;;  %v626_v30 = vmul.f32 %v579_v27, %v546_v24  ;;  %v661_v32 = vmul.f32 %v1336_v20, %v594_v54 }
 0x108   : > { %v605_v9 = vmul.f32 %v603_v55, %v581_v28  ;;  %v582_v13 = vmul.f32 %v581_v28, %v578_v60  ;;  %v639_v36 = vmul.f32 %v1334_v26, %v594_v54  ;;  %v688_v20 = vstv %s1339_s13 }
 0x109   : > { %v649_v25 = vmul.f32 %v647_v14, %v581_v28  ;;  %v625_v3 = vadd.f32 %v624_v61, %v623_v15 }
 0x10a   : > { %v606_v4 = vsub.f32 %v604_v8, %v605_v9  ;;  %v583_v19 = vsub.f32 %v580_v10, %v582_v13  ;;  %v673_v8 = vstv %s1337_s14  ;;  %s2175_s14 = sshll.u32 %s1782_s28, 3 }
 0x10b   : > { %v650_v29 = vsub.f32 %v648_v5, %v649_v25  ;;  %v627_v22 = vmul.f32 %v625_v3, %v581_v28  ;;  %v1343_v5 = vld [vmem:[%s1791_s12 + $0x1a] sm:$0x3]  ;;  %v683_v3 = vpop.permute.xlu0 %682 }
 0x10c   : > { %v614_v6 = vadd.f32 %v612_v7, %v606_v4  ;;  %v591_v21 = vadd.f32 %v589_v18, %v583_v19  ;;  %v675_v4 = vstv %s1338_s16  ;;  %s343_s16 = scalar_lea.vmem [#allocation10], %s2175_s14 }
 0x10d   : > { %v658_v35 = vadd.f32 %v656_v33, %v650_v29  ;;  %v628_v43 = vsub.f32 %v626_v30, %v627_v22  ;;  %v1341_v29 = vld [vmem:[%s1791_s12 + $0x18] sm:$0x3]  ;;  %s1161_s13 = sshll.u32 %s343_s16, 4  ;;  %s2099_s13 = int_to_ptr.vmem [resolvable:$true] %s1161_s13 }
 0x10e   : > { %v618_v31 = vadd.f32 %v617_v16, %v614_v6  ;;  %v596_v34 = vadd.f32 %v595_v17, %v591_v21  ;;  %v706_v17 = vpop.permute.xlu1 %705 }
 0x10f   : > { %v636_v47 = vadd.f32 %v634_v37, %v628_v43  ;;  %v662_v28 = vadd.f32 %v661_v32, %v658_v35  ;;  %v1345_v43 = vld [vmem:[%s1791_s12 + $0x1c] sm:$0x3]  ;;  %v711_v37 = vmul.f32 %v1343_v5, %v688_v20 }
 0x110   : > { %v692_v23 = vmul.f32 %v618_v31, %v1920_v52  ;;  %v667_v44 = vmul.f32 %v618_v31, %v1899_v40  ;;  %v736_v46 = vmul.f32 %v618_v31, %v1916_v50  ;;  %v691_v24 = vmul.f32 %v596_v34, %v1918_v51 }
 0x111   : > { %v666_v27 = vmul.f32 %v596_v34, %v1897_v39  ;;  %v735_v45 = vmul.f32 %v596_v34, %v1914_v49  ;;  %v713_v54 = vmul.f32 %v596_v34, %v1901_v41  ;;  %v714_v55 = vmul.f32 %v618_v31, %v1903_v42 }
 0x112   : > { %v640_v57 = vadd.f32 %v639_v36, %v636_v47  ;;  %v693_v58 = vadd.f32 %v692_v23, %v691_v24  ;;  %v696_v9 = vmul.f32 %v662_v28, %v1947_v12  ;;  %v671_v10 = vmul.f32 %v662_v28, %v1925_v56  ;;  %v1347_v23 = vld [vmem:[%s1791_s12 + $0x1e] sm:$0x3] }
 0x113   : > { %v668_v59 = vadd.f32 %v667_v44, %v666_v27  ;;  %v737_v60 = vadd.f32 %v736_v46, %v735_v45  ;;  %v715_v7 = vadd.f32 %v714_v55, %v713_v54  ;;  %v740_v16 = vmul.f32 %v662_v28, %v1945_v11  ;;  %v750_v54 = vpop.permute.xlu1 %749 }
 0x114   : > { %v694_v38 = vmul.f32 %v640_v57, %v1937_v1  ;;  %v669_v62 = vmul.f32 %v640_v57, %v1912_v48  ;;  %v738_v63 = vmul.f32 %v640_v57, %v1935_v0  ;;  %v716_v13 = vmul.f32 %v640_v57, %v1922_v53 }
 0x115   : > { %v718_v19 = vmul.f32 %v662_v28, %v1939_v2  ;;  %v698_v21 = vmul.f32 %v673_v8, %v618_v31  ;;  %v674_v30 = vmul.f32 %v673_v8, %v596_v34  ;;  %v742_v35 = vmul.f32 %v673_v8, %v662_v28  ;;  %v728_v28 = vpop.permute.xlu0 %727 }
 0x116   : > { %v695_v14 = vadd.f32 %v694_v38, %v693_v58  ;;  %v670_v15 = vadd.f32 %v669_v62, %v668_v59  ;;  %v739_v61 = vadd.f32 %v738_v63, %v737_v60  ;;  %v717_v18 = vadd.f32 %v716_v13, %v715_v7 }
 0x117   : > { %v720_v44 = vmul.f32 %v673_v8, %v640_v57  ;;  %v689_v24 = vmul.f32 %v1341_v29, %v688_v20  ;;  %v733_v55 = vmul.f32 %v1345_v43, %v688_v20  ;;  %v755_v59 = vmul.f32 %v1347_v23, %v688_v20  ;;  %v800_v23 = vpop.permute.xlu1 %799 }
 0x118   : > { %v697_v25 = vadd.f32 %v696_v9, %v695_v14  ;;  %v672_v6 = vadd.f32 %v671_v10, %v670_v15  ;;  %v741_v26 = vadd.f32 %v740_v16, %v739_v61  ;;  %v719_v22 = vadd.f32 %v718_v19, %v717_v18 }
 0x119   : > { %v767_v14 = vstv %s1348_s15 }
 0x11a   : > { %v699_v32 = vmul.f32 %v697_v25, %v675_v4  ;;  %v676_v33 = vmul.f32 %v675_v4, %v672_v6  ;;  %v743_v36 = vmul.f32 %v741_v26, %v675_v4  ;;  %v721_v46 = vmul.f32 %v719_v22, %v675_v4 }
 0x11b   : > { %v769_v4 = vstv %s1349_s17 }
 0x11c   : > { %v700_v47 = vsub.f32 %v698_v21, %v699_v32  ;;  %v677_v27 = vsub.f32 %v674_v30, %v676_v33  ;;  %v744_v45 = vsub.f32 %v742_v35, %v743_v36  ;;  %v722_v31 = vsub.f32 %v720_v44, %v721_v46  ;;  %v1354_v35 = vld [vmem:[%s1791_s12 + $0x22] sm:$0x3] }
 0x11d   : > { %v782_v33 = vstv %s1350_s25 }
 0x11e   : > { %v708_v34 = vadd.f32 %v706_v17, %v700_v47  ;;  %v685_v58 = vadd.f32 %v683_v3, %v677_v27  ;;  %v752_v60 = vadd.f32 %v750_v54, %v744_v45  ;;  %v730_v38 = vadd.f32 %v728_v28, %v722_v31  ;;  %v1352_v47 = vld [vmem:[%s1791_s12 + $0x20] sm:$0x3]  ;;  %v777_v45 = vpop.permute.xlu0 %776 }
 0x11f   : > { %v783_v28 = vmul.f32 %v1352_v47, %v782_v33 }
 0x120   : > { %v712_v62 = vadd.f32 %v711_v37, %v708_v34  ;;  %v690_v63 = vadd.f32 %v689_v24, %v685_v58  ;;  %v734_v7 = vadd.f32 %v733_v55, %v730_v38  ;;  %v756_v57 = vadd.f32 %v755_v59, %v752_v60  ;;  %v1358_v59 = vld [vmem:[%s1791_s12 + $0x26] sm:$0x3] }
 0x121   : > { %v805_v34 = vmul.f32 %v1354_v35, %v782_v33 }
 0x122   : > { %v785_v8 = vmul.f32 %v690_v63, %v1918_v51  ;;  %v786_v9 = vmul.f32 %v712_v62, %v1920_v52  ;;  %v760_v10 = vmul.f32 %v690_v63, %v1897_v39  ;;  %v761_v13 = vmul.f32 %v712_v62, %v1899_v40 }
 0x123   : > { %v788_v61 = vmul.f32 %v734_v7, %v1937_v1  ;;  %v829_v16 = vmul.f32 %v690_v63, %v1914_v49  ;;  %v763_v18 = vmul.f32 %v734_v7, %v1912_v48  ;;  %v830_v19 = vmul.f32 %v712_v62, %v1916_v50 }
 0x124   : > { %v787_v15 = vadd.f32 %v786_v9, %v785_v8  ;;  %v762_v17 = vadd.f32 %v761_v13, %v760_v10  ;;  %v790_v5 = vmul.f32 %v756_v57, %v1947_v12  ;;  %v807_v25 = vmul.f32 %v690_v63, %v1901_v41  ;;  %v1356_v10 = vld [vmem:[%s1791_s12 + $0x24] sm:$0x3] }
 0x125   : > { %v808_v3 = vmul.f32 %v712_v62, %v1903_v42  ;;  %v765_v26 = vmul.f32 %v756_v57, %v1925_v56  ;;  %v831_v21 = vadd.f32 %v830_v19, %v829_v16  ;;  %v832_v29 = vmul.f32 %v734_v7, %v1935_v0 }
 0x126   : > { %v789_v20 = vadd.f32 %v788_v61, %v787_v15  ;;  %v764_v6 = vadd.f32 %v763_v18, %v762_v17  ;;  %v810_v32 = vmul.f32 %v734_v7, %v1922_v53  ;;  %v834_v37 = vmul.f32 %v756_v57, %v1945_v11 }
 0x127   : > { %v809_v22 = vadd.f32 %v808_v3, %v807_v25  ;;  %v833_v43 = vadd.f32 %v832_v29, %v831_v21  ;;  %v792_v44 = vmul.f32 %v767_v14, %v712_v62  ;;  %v812_v27 = vmul.f32 %v756_v57, %v1939_v2  ;;  %v822_v3 = vpop.permute.xlu0 %821 }
 0x128   : > { %v791_v30 = vadd.f32 %v790_v5, %v789_v20  ;;  %v766_v36 = vadd.f32 %v765_v26, %v764_v6  ;;  %v768_v54 = vmul.f32 %v767_v14, %v690_v63  ;;  %v836_v8 = vmul.f32 %v767_v14, %v756_v57  ;;  %v844_v63 = vpop.permute.xlu1 %843 }
 0x129   : > { %v811_v24 = vadd.f32 %v810_v32, %v809_v22  ;;  %v835_v31 = vadd.f32 %v834_v37, %v833_v43  ;;  %v814_v13 = vmul.f32 %v767_v14, %v734_v7  ;;  %v849_v16 = vmul.f32 %v1358_v59, %v782_v33 }
 0x12a   : > { %v793_v46 = vmul.f32 %v791_v30, %v769_v4  ;;  %v770_v55 = vmul.f32 %v769_v4, %v766_v36  ;;  %v827_v19 = vmul.f32 %v1356_v10, %v782_v33  ;;  %v876_v59 = vstv %s1361_s0  ;;  %v1363_v10 = vld [vmem:[%s1791_s12 + $0x28] sm:$0x3] }
 0x12b   : > { %v813_v60 = vadd.f32 %v812_v27, %v811_v24  ;;  %v837_v9 = vmul.f32 %v835_v31, %v769_v4 }
 0x12c   : > { %v794_v58 = vsub.f32 %v792_v44, %v793_v46  ;;  %v771_v38 = vsub.f32 %v768_v54, %v770_v55  ;;  %v863_v55 = vstv %s1360_s7  ;;  %v894_v31 = vpop.permute.xlu1 %893  ;;  %s1611_s7 = smov [#allocation10]  }
 0x12d   : > { %v815_v15 = vmul.f32 %v813_v60, %v769_v4  ;;  %v838_v17 = vsub.f32 %v836_v8, %v837_v9  ;;  %v1365_v60 = vld [vmem:[%s1791_s12 + $0x2a] sm:$0x3]  ;;  %s1534_s0 = sshll.u32 %s1611_s7, 4  ;;  %s1535_s0 = int_to_ptr.vmem [resolvable:$false] %s1534_s0 }
 0x12e   : > { %v802_v62 = vadd.f32 %v800_v23, %v794_v58  ;;  %v779_v61 = vadd.f32 %v777_v45, %v771_v38  ;;  %v861_v23 = vstv %s1359_s29  ;;  %s1530_s29 = scalar_lea.vmem %s2099_s13, 128  ;;  %p1537_p12 = scmp.lt.s32.totalorder %s2099_s13, %s1535_s0 }
 0x12f   : > { %v816_v20 = vsub.f32 %v814_v13, %v815_v15  ;;  %v846_v25 = vadd.f32 %v844_v63, %v838_v17  ;;  %p1531_p10 = scmp.ne.s32.totalorder %s2099_s13, %s1530_s29 }
 0x130   : > { %v806_v18 = vadd.f32 %v805_v34, %v802_v62  ;;  %v784_v5 = vadd.f32 %v783_v28, %v779_v61 }
 0x131   : > { %v824_v6 = vadd.f32 %v822_v3, %v816_v20  ;;  %v850_v7 = vadd.f32 %v849_v16, %v846_v25  ;;  %v871_v16 = vpop.permute.xlu0 %870  ;;  %v899_v20 = vmul.f32 %v1365_v60, %v876_v59  ;;  %v1369_v25 = vld [vmem:[%s1791_s12 + $0x2e] sm:$0x3]  ;;  %p1532_p2 = pnand %p1531_p10, %p2176_p1 }
 0x132   : > { %v880_v57 = vmul.f32 %v806_v18, %v1920_v52  ;;  %v855_v26 = vmul.f32 %v806_v18, %v1899_v40  ;;  %v879_v14 = vmul.f32 %v784_v5, %v1918_v51  ;;  %v854_v4 = vmul.f32 %v784_v5, %v1897_v39 }
 0x133   : > { %v828_v21 = vadd.f32 %v827_v19, %v824_v6  ;;  %v923_v29 = vmul.f32 %v784_v5, %v1914_v49  ;;  %v924_v30 = vmul.f32 %v806_v18, %v1916_v50  ;;  %v901_v33 = vmul.f32 %v784_v5, %v1901_v41  ;;  %p1533_p7 = pneg %p1532_p2 }
 0x134   : > { %v881_v22 = vadd.f32 %v880_v57, %v879_v14  ;;  %v856_v32 = vadd.f32 %v855_v26, %v854_v4  ;;  %v884_v44 = vmul.f32 %v850_v7, %v1947_v12  ;;  %v859_v46 = vmul.f32 %v850_v7, %v1925_v56  ;;  %v1367_v4 = vld [vmem:[%s1791_s12 + $0x2c] sm:$0x3] }
 0x135   : > { %v882_v35 = vmul.f32 %v828_v21, %v1937_v1  ;;  %v857_v36 = vmul.f32 %v828_v21, %v1912_v48  ;;  %v925_v43 = vadd.f32 %v924_v30, %v923_v29  ;;  %v926_v37 = vmul.f32 %v828_v21, %v1935_v0 }
 0x136   : > { %v902_v47 = vmul.f32 %v806_v18, %v1903_v42  ;;  %v928_v54 = vmul.f32 %v850_v7, %v1945_v11  ;;  %v904_v58 = vmul.f32 %v828_v21, %v1922_v53  ;;  %v886_v9 = vmul.f32 %v861_v23, %v806_v18  ;;  %v938_v18 = vpop.permute.xlu1 %937 }
 0x137   : > { %v883_v24 = vadd.f32 %v882_v35, %v881_v22  ;;  %v858_v27 = vadd.f32 %v857_v36, %v856_v32  ;;  %v927_v45 = vadd.f32 %v926_v37, %v925_v43  ;;  %v862_v62 = vmul.f32 %v861_v23, %v784_v5  ;;  %v916_v37 = vpop.permute.xlu0 %915 }
 0x138   : > { %v903_v34 = vadd.f32 %v902_v47, %v901_v33  ;;  %v906_v15 = vmul.f32 %v850_v7, %v1939_v2  ;;  %v930_v63 = vmul.f32 %v861_v23, %v850_v7  ;;  %v877_v57 = vmul.f32 %v1363_v10, %v876_v59 }
 0x139   : > { %v885_v28 = vadd.f32 %v884_v44, %v883_v24  ;;  %v860_v38 = vadd.f32 %v859_v46, %v858_v27  ;;  %v929_v8 = vadd.f32 %v928_v54, %v927_v45  ;;  %v908_v29 = vmul.f32 %v861_v23, %v828_v21 }
 0x13a   : > { %v905_v13 = vadd.f32 %v904_v58, %v903_v34  ;;  %v943_v32 = vmul.f32 %v1369_v25, %v876_v59  ;;  %v921_v35 = vmul.f32 %v1367_v4, %v876_v59 }
 0x13b   : > { %v887_v61 = vmul.f32 %v885_v28, %v863_v55  ;;  %v864_v17 = vmul.f32 %v863_v55, %v860_v38  ;;  %v931_v19 = vmul.f32 %v929_v8, %v863_v55 }
 0x13c   : > { %v907_v3 = vadd.f32 %v906_v15, %v905_v13  ;;  %v957_v15 = vstv %s1371_s9 }
 0x13d   : > { %v888_v6 = vsub.f32 %v886_v9, %v887_v61  ;;  %v865_v26 = vsub.f32 %v862_v62, %v864_v17  ;;  %v932_v14 = vsub.f32 %v930_v63, %v931_v19  ;;  %v970_v61 = vstv %s1372_s10  ;;  %v1376_v63 = vld [vmem:[%s1791_s12 + $0x32] sm:$0x3] }
 0x13e   : > { %v909_v30 = vmul.f32 %v907_v3, %v863_v55 }
 0x13f   : > { %v896_v5 = vadd.f32 %v894_v31, %v888_v6  ;;  %v873_v22 = vadd.f32 %v871_v16, %v865_v26  ;;  %v940_v33 = vadd.f32 %v938_v18, %v932_v14  ;;  %v955_v31 = vstv %s1370_s26  ;;  %v988_v6 = vpop.permute.xlu1 %987  ;;  %v1374_v26 = vld [vmem:[%s1791_s12 + $0x30] sm:$0x3]  ;;  %s1536_s26 = scalar_lea.vmem %s1535_s0, 256 }
 0x140   : > { %v910_v36 = vsub.f32 %v908_v29, %v909_v30  ;;  %p1538_p4 = scmp.lt.s32.totalorder %s1536_s26, %s1530_s29 }
 0x141   : > { %v900_v7 = vadd.f32 %v899_v20, %v896_v5  ;;  %v878_v43 = vadd.f32 %v877_v57, %v873_v22  ;;  %v944_v46 = vadd.f32 %v943_v32, %v940_v33  ;;  %v993_v22 = vmul.f32 %v1376_v63, %v970_v61  ;;  %v965_v32 = vpop.permute.xlu0 %964 }
 0x142   : > { %v918_v44 = vadd.f32 %v916_v37, %v910_v36  ;;  %v971_v37 = vmul.f32 %v1374_v26, %v970_v61  ;;  %v1049_v63 = vstv %s1381_s11  ;;  %p1539_p6 = por %p1538_p4, %p1537_p12 }
 0x143   : > { %v973_v47 = vmul.f32 %v878_v43, %v1918_v51  ;;  %v974_v24 = vmul.f32 %v900_v7, %v1920_v52  ;;  %v948_v23 = vmul.f32 %v878_v43, %v1897_v39  ;;  %v949_v27 = vmul.f32 %v900_v7, %v1899_v40 }
 0x144   : > { %v922_v21 = vadd.f32 %v921_v35, %v918_v44  ;;  %v1017_v54 = vmul.f32 %v878_v43, %v1914_v49  ;;  %v1018_v55 = vmul.f32 %v900_v7, %v1916_v50  ;;  %v978_v60 = vmul.f32 %v944_v46, %v1947_v12  ;;  %p1540_p13 = pnand %p1539_p6, %p1533_p7 }
 0x145   : > { %v975_v45 = vadd.f32 %v974_v24, %v973_v47  ;;  %v950_v58 = vadd.f32 %v949_v27, %v948_v23  ;;  %v995_v8 = vmul.f32 %v878_v43, %v1901_v41  ;;  %v953_v62 = vmul.f32 %v944_v46, %v1925_v56  ;;  %v1380_v47 = vld [vmem:[%s1791_s12 + $0x36] sm:$0x3]  ;;  %v1378_v24 = vld [vmem:[%s1791_s12 + $0x34] sm:$0x3] }
 0x146   : > { %v976_v34 = vmul.f32 %v922_v21, %v1937_v1  ;;  %v951_v59 = vmul.f32 %v922_v21, %v1912_v48  ;;  %v1019_v28 = vadd.f32 %v1018_v55, %v1017_v54  ;;  %v1020_v38 = vmul.f32 %v922_v21, %v1935_v0 }
 0x147   : > { %v996_v13 = vmul.f32 %v900_v7, %v1903_v42  ;;  %v1022_v17 = vmul.f32 %v944_v46, %v1945_v11  ;;  %v998_v3 = vmul.f32 %v922_v21, %v1922_v53  ;;  %v980_v57 = vmul.f32 %v955_v31, %v900_v7 }
 0x148   : > { %v977_v9 = vadd.f32 %v976_v34, %v975_v45  ;;  %v952_v10 = vadd.f32 %v951_v59, %v950_v58  ;;  %v1021_v16 = vadd.f32 %v1020_v38, %v1019_v28  ;;  %v956_v14 = vmul.f32 %v955_v31, %v878_v43  ;;  %v1032_v34 = vpop.permute.xlu1 %1031  ;;  %v1010_v38 = vpop.permute.xlu0 %1009 }
 0x149   : > { %v997_v25 = vadd.f32 %v996_v13, %v995_v8  ;;  %v1000_v5 = vmul.f32 %v944_v46, %v1939_v2  ;;  %v1024_v33 = vmul.f32 %v955_v31, %v944_v46  ;;  %v1002_v43 = vmul.f32 %v955_v31, %v922_v21 }
 0x14a   : > { %v979_v19 = vadd.f32 %v978_v60, %v977_v9  ;;  %v954_v20 = vadd.f32 %v953_v62, %v952_v10  ;;  %v1023_v4 = vadd.f32 %v1022_v17, %v1021_v16  ;;  %v1037_v55 = vmul.f32 %v1380_v47, %v970_v61 }
 0x14b   : > { %v999_v30 = vadd.f32 %v998_v3, %v997_v25  ;;  %v1015_v58 = vmul.f32 %v1378_v24, %v970_v61 }
 0x14c   : > { %v981_v18 = vmul.f32 %v979_v19, %v957_v15  ;;  %v958_v29 = vmul.f32 %v957_v15, %v954_v20  ;;  %v1025_v35 = vmul.f32 %v1023_v4, %v957_v15  ;;  %v1051_v20 = vstv %s1382_s23  ;;  %v1082_v26 = vpop.permute.xlu1 %1081 }
 0x14d   : > { %v1001_v23 = vadd.f32 %v1000_v5, %v999_v30 }
 0x14e   : > { %v982_v36 = vsub.f32 %v980_v57, %v981_v18  ;;  %v959_v44 = vsub.f32 %v956_v14, %v958_v29  ;;  %v1026_v7 = vsub.f32 %v1024_v33, %v1025_v35  ;;  %v1064_v18 = vstv %s1383_s8  ;;  %v1385_v29 = vld [vmem:[%s1791_s12 + $0x38] sm:$0x3]  ;;  %v1391_v33 = vld [vmem:[%s1791_s12 + $0x3e] sm:$0x3] }
 0x14f   : > { %v1003_v54 = vmul.f32 %v1001_v23, %v957_v15  ;;  %v1065_v47 = vmul.f32 %v1385_v29, %v1064_v18  ;;  %v1389_v23 = vld [vmem:[%s1791_s12 + $0x3c] sm:$0x3] }
 0x150   : > { %v990_v27 = vadd.f32 %v988_v6, %v982_v36  ;;  %v967_v45 = vadd.f32 %v965_v32, %v959_v44  ;;  %v1034_v46 = vadd.f32 %v1032_v34, %v1026_v7  ;;  %v1131_v7 = vmul.f32 %v1391_v33, %v1064_v18 }
 0x151   : > { %v1004_v28 = vsub.f32 %v1002_v43, %v1003_v54 }
 0x152   : > { %v994_v59 = vadd.f32 %v993_v22, %v990_v27  ;;  %v972_v60 = vadd.f32 %v971_v37, %v967_v45  ;;  %v1038_v31 = vadd.f32 %v1037_v55, %v1034_v46  ;;  %v1059_v22 = vpop.permute.xlu0 %1058  ;;  %v1126_v55 = vpop.permute.xlu1 %1125 }
 0x153   : > { %v1012_v8 = vadd.f32 %v1010_v38, %v1004_v28 }
 0x154   : > { %v1067_v9 = vmul.f32 %v972_v60, %v1918_v51  ;;  %v1068_v10 = vmul.f32 %v994_v59, %v1920_v52  ;;  %v1042_v62 = vmul.f32 %v972_v60, %v1897_v39  ;;  %v1043_v21 = vmul.f32 %v994_v59, %v1899_v40 }
 0x155   : > { %v1016_v13 = vadd.f32 %v1015_v58, %v1012_v8  ;;  %v1111_v61 = vmul.f32 %v972_v60, %v1914_v49  ;;  %v1112_v17 = vmul.f32 %v994_v59, %v1916_v50  ;;  %v1089_v52 = vmul.f32 %v972_v60, %v1901_v41 }
 0x156   : > { %v1069_v15 = vadd.f32 %v1068_v10, %v1067_v9  ;;  %v1044_v16 = vadd.f32 %v1043_v21, %v1042_v62  ;;  %v1090_v25 = vmul.f32 %v994_v59, %v1903_v42  ;;  %v1072_v49 = vmul.f32 %v1038_v31, %v1947_v12  ;;  %v1104_v28 = vpop.permute.xlu0 %1103 }
 0x157   : > { %v1070_v19 = vmul.f32 %v1016_v13, %v1937_v1  ;;  %v1045_v51 = vmul.f32 %v1016_v13, %v1912_v48  ;;  %v1113_v39 = vadd.f32 %v1112_v17, %v1111_v61  ;;  %v1114_v40 = vmul.f32 %v1016_v13, %v1935_v0  ;;  %v1387_v0 = vld [vmem:[%s1791_s12 + $0x3a] sm:$0x3]  ;;  %s1400_s12 = sshll.u32 %s1666_s22, 5  ;;  %s1149_s22 = scalar_lea.sflag [#allocation4], %s1782_s28 }
 0x158   : > { %v1047_v50 = vmul.f32 %v1038_v31, %v1925_v56  ;;  %v1116_v1 = vmul.f32 %v1038_v31, %v1945_v11  ;;  %v1091_v48 = vadd.f32 %v1090_v25, %v1089_v52  ;;  %v1092_v41 = vmul.f32 %v1016_v13, %v1922_v53  ;;  %s2104_s25 = scalar_lea.hbm %s2152_s5, %s1400_s12 }
 0x159   : > { %v1071_v3 = vadd.f32 %v1070_v19, %v1069_v15  ;;  %v1046_v6 = vadd.f32 %v1045_v51, %v1044_v16  ;;  %v1115_v57 = vadd.f32 %v1114_v40, %v1113_v39  ;;  %v1094_v12 = vmul.f32 %v1038_v31, %v1939_v2 }
 0x15a   : > { %v1093_v30 = vadd.f32 %v1092_v41, %v1091_v48  ;;  %v1074_v5 = vmul.f32 %v1049_v63, %v994_v59  ;;  %v1050_v32 = vmul.f32 %v1049_v63, %v972_v60  ;;  %v1118_v35 = vmul.f32 %v1049_v63, %v1038_v31 }
 0x15b   : > { %v1073_v14 = vadd.f32 %v1072_v49, %v1071_v3  ;;  %v1048_v4 = vadd.f32 %v1047_v50, %v1046_v6  ;;  %v1117_v42 = vadd.f32 %v1116_v1, %v1115_v57  ;;  %v1087_v37 = vmul.f32 %v1387_v0, %v1064_v18 }
 0x15c   : > { %v1095_v53 = vadd.f32 %v1094_v12, %v1093_v30  ;;  %v1096_v45 = vmul.f32 %v1049_v63, %v1016_v13  ;;  %v1109_v58 = vmul.f32 %v1389_v23, %v1064_v18 }
 0x15d   : > { %v1075_v56 = vmul.f32 %v1073_v14, %v1051_v20  ;;  %v1052_v11 = vmul.f32 %v1051_v20, %v1048_v4  ;;  %v1119_v36 = vmul.f32 %v1117_v42, %v1051_v20 }
 0x15e   : > { %v1097_v2 = vmul.f32 %v1095_v53, %v1051_v20 }
 0x15f   : > { %v1076_v44 = vsub.f32 %v1074_v5, %v1075_v56  ;;  %v1053_v24 = vsub.f32 %v1050_v32, %v1052_v11  ;;  %v1120_v27 = vsub.f32 %v1118_v35, %v1119_v36 }
 0x160   : > { %v1098_v59 = vsub.f32 %v1096_v45, %v1097_v2 }
 0x161   : > { %v1084_v43 = vadd.f32 %v1082_v26, %v1076_v44  ;;  %v1061_v54 = vadd.f32 %v1059_v22, %v1053_v24  ;;  %v1128_v34 = vadd.f32 %v1126_v55, %v1120_v27 }
 0x162   : > { %v1106_v8 = vadd.f32 %v1104_v28, %v1098_v59 }
 0x163   : > { %v1088_v60 = vadd.f32 %v1087_v37, %v1084_v43  ;;  %v1066_v46 = vadd.f32 %v1065_v47, %v1061_v54  ;;  %v1132_v38 = vadd.f32 %v1131_v7, %v1128_v34 }
 0x164   : > { %v1110_v21 = vadd.f32 %v1109_v58, %v1106_v8 }
 0x165   : > { %v1393_v9 = vclamps-f32 %v1088_v60, 1.0  ;;  %v1392_v10 = vclamps-f32 %v1066_v46, 1.0  ;;  %v1397_v62 = vclamps-f32 %v1132_v38, 1.0 }
 0x166   : > { %v1395_v31 = vclamps-f32 %v1110_v21, 1.0 }
 0x167   : > { %1394 = vst [vmem:[%s343_s16 + $0x2] sm:$0x3] %v1393_v9  ;;  %1135 = vst [vmem:[%s343_s16] sm:$0x3] %v1392_v10 }
 0x168   : > { %1398 = vst [vmem:[%s343_s16 + $0x6] sm:$0x3] %v1397_v62  ;;  %1396 = vst [vmem:[%s343_s16 + $0x4] sm:$0x3] %v1395_v31 }
 0x169   : > { %1543 = shalt.err (!%p1540_p13)
}
 0x16a   : > { %s1544_s9 = scalar_lea.hbm %s2104_s25, 128  ;;  %s1548_s23 = scalar_lea.hbm %s2152_s5, 256 }
 0x16b   : > { %p1545_p0 = scmp.ne.s32.totalorder %s2104_s25, %s1544_s9  ;;  %p1549_p9 = scmp.lt.s32.totalorder %s2104_s25, %s2152_s5 }
 0x16c   : > { %p1550_p5 = scmp.lt.s32.totalorder %s1548_s23, %s1544_s9 }
 0x16d   : > { %p1546_p3 = pnand %p1545_p0, %p2176_p1 }
 0x16e   : > { %p1551_p10 = por %p1550_p5, %p1549_p9 }
 0x16f   : > { %p1547_p8 = pneg %p1546_p3 }
 0x171   : > { %p1552_p2 = pnand %p1551_p10, %p1547_p8 }
 0x173   : > { %1555 = shalt.err (!%p1552_p2)
}
 0x174   : > { %s1612_s16 = smov 32   ;;  %s1613_s12 = smov 64  }
 0x175   : > { %s1614_s15 = smov 2  }
 0x176   : > { %1413 = dma.vmem_to_hbm [thread:$0]  (%p2176_p1), %s2099_s13, 128, %s2104_s25, %s1149_s22, %s1612_s16, %s1613_s12, %s1614_s15  }
 0x177 PF: > { %s1176_s17 = sand.u32 1, %s1590_s18   ;;  %p2177_p7 = scmp.ne.s32.totalorder %s2163_s6, 0 }
 0x178   : > { %s1177_s29 = scalar_lea.sflag [#allocation4], %s1176_s17 }
 0x179   : > { %p1423_p12 = pnand %p1278_p11, %p2177_p7 }
 0x17b   : > { %p1424_p4 = pneg %p1423_p12 }
 0x17d   : > { %1585 = dma.done.wait (%p1424_p4), %s1177_s29, 128  }
 0x17e   : > { %1587 = vsyncadd (%p1424_p4), %s1177_s29, 4294967168  ;;  %p20_p6 = scmp.ge.s32.totalorder %s1670_s24, 4   ;;  %s2178_s18 = smov %s1594_s19 }
 0x17f   : > { %s2179_s19 = smov %s1598_s20  ;;  %s2180_s20 = smov %s1682_s27 }
 0x180   : > { %s2181_s21 = smov %s1670_s24  ;;  %22 = sbr.rel (!%p20_p6) target bundleno = 9 (0x9), region = 211 }
 0x185   :  { %1182 = vsyncpa [#allocation3], 1 }
 0x186   :  { %1184 = vsyncpa [#allocation3 + $0x1], 1 }
 0x187   :  { %1185 = vsyncpa [#allocation4], 1 }
 0x188   :  { %1187 = vsyncpa [#allocation4 + $0x1], 1 }
 0x189   :  { %1188 = vsyncpa [#allocation5], 1 }
 0x18a   :  { %1190 = vsyncpa [#allocation5 + $0x1], 1 }
 0x18b   :  { %1191 = vsyncpa [#allocation7], 1 }

</bundles_post_ra>
